<compile_context>
chip_gen: v5e
topology: v5e:2x2
jax: 0.10.0
libtpu: 0.0.40
codegen_flags: <defaults>
</compile_context>

<pallas_src>
import functools

import jax
import jax.numpy as jnp
from jax.experimental import pallas as pl
from jax.experimental.pallas import tpu as pltpu


def _affine_coupling_kernel(x_ref, mask_ref,
                            w1m_ref, b1_ref, w2_ref, b2_ref, w3_ref, b3_ref,
                            *out_refs, fused, act_dtype):
    d_half = x_ref.shape[1]
    x = x_ref[...]                      # (TB, Dh) f32 batch tile
    mask = mask_ref[...]                # (1, Dh)  f32 0/1 mask, broadcast over batch
    x1 = mask * x                       # only needed for the z1 half of the output
    x2 = x - x1                         # == (1 - mask) * x

    mxu_dtype = w1m_ref.dtype           # bf16 (default) or f32 weights
    # net(mask * x): the mask is pre-folded into w1 (w1m = mask[:, None] * w1),
    # so x feeds the first MXU matmul directly.  MXU operands in mxu_dtype with
    # f32 accumulation; hidden tanh optionally in bf16 (v6e/v7x), final
    # tanh/exp/mul producing s/z2 stay f32 on VPU/EUP.
    h = jnp.dot(x.astype(mxu_dtype), w1m_ref[...],
                preferred_element_type=jnp.float32) + b1_ref[...]
    h = jnp.tanh(h.astype(act_dtype))
    h = jnp.dot(h.astype(mxu_dtype), w2_ref[...],
                preferred_element_type=jnp.float32) + b2_ref[...]
    h = jnp.tanh(h.astype(act_dtype))
    t = jnp.dot(h.astype(mxu_dtype), w3_ref[...],
                preferred_element_type=jnp.float32) + b3_ref[...]

    s = jnp.tanh(t) * 0.5 + 0.5         # scale_fn_example
    z2 = x2 * jnp.exp(s) + t

    if fused:
        out_ref, ssum_ref = out_refs
        out_ref[:, :d_half] = x1        # static, lane-aligned column slice
        out_ref[:, d_half:] = z2        # static, lane-aligned column slice
    else:
        z1_ref, z2_ref, ssum_ref = out_refs
        z1_ref[...] = x1
        z2_ref[...] = z2
    ssum_ref[...] = jnp.sum(s, axis=1, keepdims=True)      # per-row sum(s)


def _default_vmem_limit_bytes():
    """Pick a scoped-VMEM cap per chip generation (128 MiB physical on v4/v5e/v6e,
    64 MiB on v7x)."""
    try:
        kind = jax.devices()[0].device_kind.lower()
    except Exception:
        kind = ""
    if ("v4" in kind) or ("v5" in kind) or ("v6" in kind):
        return 100 * 1024 * 1024
    return 48 * 1024 * 1024


def _pick_batch_tile(B, d_half, H, mxu_bytes, vmem_limit_bytes):
    """Largest sublane-aligned batch tile (<= 2048) that fits the VMEM budget,
    split so the grid has >= 2 steps (v7x megacore) whenever B >= 16."""
    # Resident constants (double-buffered by default pipelining).
    const_bytes = 2 * ((d_half * H + H * H + H * d_half) * mxu_bytes
                       + (2 * H + 2 * d_half) * 4)
    headroom = 4 * 1024 * 1024
    budget = max(vmem_limit_bytes - const_bytes - headroom, 1 << 20)
    # Per-row bytes: double-buffered x + fused out + ssum (f32) + hidden scratch.
    per_row = 4 * (2 * d_half + 2 * (2 * d_half) + 2 * 1 + 2 * H)
    tb = int(min(2048, budget // per_row, B))
    tb = max(tb, 1)
    if tb < B:
        tb = max(8, (tb // 8) * 8)
    elif B >= 16:
        # Full batch would fit in one tile; split into >= 2 grid steps so the
        # "parallel" axis can shard across both v7x TensorCores.
        tb = ((B + 1) // 2 + 7) // 8 * 8
    return int(tb)


def affine_coupling_forward(x, mask, params, *, tb=None, use_bf16=True,
                            bf16_hidden_act=False, vmem_limit_bytes=None):
    """x: (B, input_dim // 2) f32. Returns (z: (B, input_dim), log_det: (B,))."""
    w1, b1, w2, b2, w3, b3, lsf = params
    B, d_half = x.shape
    H = w1.shape[1]
    # torch's `sum(s, dim=1) + log_scale_factor` broadcasts (B,) + (D/2,):
    assert lsf.shape[0] == B, "requires batch == input_dim // 2 (as in the torch code)"

    mask2d = mask.reshape(1, d_half).astype(jnp.float32)
    # Fold the coupling mask into the first layer: (mask*x) @ w1 == x @ (mask[:,None]*w1)
    # (exact for binary 0/1 masks).
    w1m = mask2d.reshape(d_half, 1) * w1

    mxu_dtype = jnp.bfloat16 if use_bf16 else jnp.float32
    act_dtype = jnp.bfloat16 if (use_bf16 and bf16_hidden_act) else jnp.float32
    mxu_bytes = jnp.dtype(mxu_dtype).itemsize

    if vmem_limit_bytes is None:
        vmem_limit_bytes = _default_vmem_limit_bytes()

    if tb is None:
        tb = _pick_batch_tile(B, d_half, H, mxu_bytes, vmem_limit_bytes)
    tb = min(int(tb), B)
    if B > tb:
        tb = max(8, (tb // 8) * 8)
    grid = (pl.cdiv(B, tb),)

    # Fused single output only when both column halves stay lane-aligned.
    fused = (d_half % 128 == 0)

    args = (
        x.astype(jnp.float32), mask2d,
        w1m.astype(mxu_dtype), b1.reshape(1, H).astype(jnp.float32),
        w2.astype(mxu_dtype), b2.reshape(1, H).astype(jnp.float32),
        w3.astype(mxu_dtype), b3.reshape(1, d_half).astype(jnp.float32),
    )

    def batch_spec(cols):
        return pl.BlockSpec((tb, cols), lambda i: (i, 0))

    def const_spec(shape):
        return pl.BlockSpec(shape, lambda i, _n=len(shape): (0,) * _n)

    in_specs = [
        batch_spec(d_half),           # x        (tiled over batch)
        const_spec((1, d_half)),      # mask
        const_spec((d_half, H)),      # w1 (masked)
        const_spec((1, H)),           # b1
        const_spec((H, H)),           # w2
        const_spec((1, H)),           # b2
        const_spec((H, d_half)),      # w3
        const_spec((1, d_half)),      # b3
    ]
    if fused:
        out_specs = (batch_spec(2 * d_half), batch_spec(1))
        out_shape = (jax.ShapeDtypeStruct((B, 2 * d_half), jnp.float32),
                     jax.ShapeDtypeStruct((B, 1), jnp.float32))
    else:
        out_specs = (batch_spec(d_half), batch_spec(d_half), batch_spec(1))
        out_shape = (jax.ShapeDtypeStruct((B, d_half), jnp.float32),
                     jax.ShapeDtypeStruct((B, d_half), jnp.float32),
                     jax.ShapeDtypeStruct((B, 1), jnp.float32))

    # Advisory cost estimate so XLA can overlap the custom call with neighbors.
    flops = 2 * B * (d_half * H + H * H + H * d_half) + 8 * B * d_half
    transcendentals = B * (2 * H + 2 * d_half)                  # tanh, tanh, tanh+exp
    bytes_accessed = (4 * (B * d_half + B * 2 * d_half + B)     # x + z + ssum (f32)
                      + mxu_bytes * (d_half * H + H * H + H * d_half)
                      + 4 * (2 * H + 2 * d_half))

    kernel = functools.partial(_affine_coupling_kernel,
                               fused=fused, act_dtype=act_dtype)

    outs = pl.pallas_call(
        kernel,
        grid=grid,
        in_specs=in_specs,
        out_specs=out_specs,
        out_shape=out_shape,
        compiler_params=pltpu.CompilerParams(
            dimension_semantics=("parallel",),          # megacore shard on v7x
            vmem_limit_bytes=int(vmem_limit_bytes),
        ),
        cost_estimate=pl.CostEstimate(flops=int(flops),
                                      transcendentals=int(transcendentals),
                                      bytes_accessed=int(bytes_accessed)),
    )(*args)

    if fused:
        z, ssum = outs
    else:
        z1, z2, ssum = outs
        z = jnp.concatenate([z1, z2], axis=1)   # unaligned fallback only
    log_det = ssum[:, 0] + lsf                  # torch broadcast: (B,) + (D/2,), B == D/2
    return z, log_det


def _init_params(key, input_dim, hidden_dim):
    """Deterministic init mimicking torch.nn.Linear defaults; log_scale_factor = zeros."""
    d_half = input_dim // 2
    dims = [(d_half, hidden_dim), (hidden_dim, hidden_dim), (hidden_dim, d_half)]
    params = []
    for (fan_in, fan_out) in dims:
        key, kw, kb = jax.random.split(key, 3)
        bound = 1.0 / jnp.sqrt(fan_in)
        w = jax.random.uniform(kw, (fan_in, fan_out), jnp.float32, -bound, bound)
        b = jax.random.uniform(kb, (fan_out,), jnp.float32, -bound, bound)
        params += [w, b]
    lsf = jnp.zeros((d_half,), jnp.float32)  # nn.Parameter(torch.zeros(input_dim // 2))
    return tuple(params) + (lsf,)


def _reference_forward(x, mask, params, use_bf16, bf16_hidden_act=False):
    """Pure-JAX reference with identical semantics and matmul/activation precision."""
    w1, b1, w2, b2, w3, b3, lsf = params
    mxu = jnp.bfloat16 if use_bf16 else jnp.float32
    act = jnp.bfloat16 if (use_bf16 and bf16_hidden_act) else jnp.float32
    x1 = mask * x
    x2 = (1.0 - mask) * x
    w1m = (mask[:, None] * w1).astype(mxu)
    h = jnp.dot(x.astype(mxu), w1m, preferred_element_type=jnp.float32) + b1
    h = jnp.tanh(h.astype(act))
    h = jnp.dot(h.astype(mxu), w2.astype(mxu),
                preferred_element_type=jnp.float32) + b2
    h = jnp.tanh(h.astype(act))
    t = jnp.dot(h.astype(mxu), w3.astype(mxu),
                preferred_element_type=jnp.float32) + b3
    s = jnp.tanh(t) * 0.5 + 0.5
    z2 = x2 * jnp.exp(s) + t
    z = jnp.concatenate([x1, z2], axis=1)
    log_det = jnp.sum(s, axis=1) + lsf
    return z, log_det


if __name__ == "__main__":
    key = jax.random.PRNGKey(0)

    # Case 1: lane/MXU-aligned shapes -> fused single output, auto batch tile
    # (>= 2 grid steps for megacore), bf16 MXU operands, f32 activations.
    input_dim, hidden_dim = 512, 128
    d_half = input_dim // 2            # 256
    batch = d_half                     # torch broadcast needs B == input_dim // 2
    key, kx, kp = jax.random.split(key, 3)
    x = jax.random.normal(kx, (batch, d_half), jnp.float32)
    mask = (jnp.arange(d_half) % 2).astype(jnp.float32)   # alternating 0/1 mask
    params = _init_params(kp, input_dim, hidden_dim)

    z, log_det = affine_coupling_forward(x, mask, params, use_bf16=True)
    (z, log_det) = jax.block_until_ready((z, log_det))
    z_ref, ld_ref = _reference_forward(x, mask, params, use_bf16=True)
    assert z.shape == (batch, input_dim) and log_det.shape == (batch,)
    assert jnp.allclose(z, z_ref, atol=1e-4, rtol=1e-4)
    assert jnp.allclose(log_det, ld_ref, atol=1e-3, rtol=1e-3)

    # Case 2: tiny, unaligned shapes (original demo sizes), pure f32 path.
    # d_half < 128 -> falls back to the two-output + wrapper-concat path
    # (at these sizes Pallas is pure fixed overhead anyway; kept for parity).
    input_dim, hidden_dim = 8, 32
    d_half = input_dim // 2            # 4
    batch = d_half
    key, kx, kp = jax.random.split(key, 3)
    x = jax.random.normal(kx, (batch, d_half), jnp.float32)
    mask = (jnp.arange(d_half) % 2).astype(jnp.float32)
    params = _init_params(kp, input_dim, hidden_dim)

    z, log_det = affine_coupling_forward(x, mask, params, use_bf16=False)
    (z, log_det) = jax.block_until_ready((z, log_det))
    z_ref, ld_ref = _reference_forward(x, mask, params, use_bf16=False)
    assert z.shape == (batch, input_dim) and log_det.shape == (batch,)
    assert jnp.allclose(z, z_ref, atol=1e-5, rtol=1e-5)
    assert jnp.allclose(log_det, ld_ref, atol=1e-5, rtol=1e-5)

    print("KERNEL_OK")
</pallas_src>

<mosaic_0001>
module attributes {stable_mosaic.version = 11 : i64} {
  func.func @_affine_coupling_kernel(%arg0: i32, %arg1: memref<128x256xf32, #tpu.memory_space<vmem>>, %arg2: memref<1x256xf32, #tpu.memory_space<vmem>>, %arg3: memref<256x128xbf16, #tpu.memory_space<vmem>>, %arg4: memref<1x128xf32, #tpu.memory_space<vmem>>, %arg5: memref<128x128xbf16, #tpu.memory_space<vmem>>, %arg6: memref<1x128xf32, #tpu.memory_space<vmem>>, %arg7: memref<128x256xbf16, #tpu.memory_space<vmem>>, %arg8: memref<1x256xf32, #tpu.memory_space<vmem>>, %arg9: memref<128x512xf32, #tpu.memory_space<vmem>>, %arg10: memref<128x1xf32, #tpu.memory_space<vmem>>) attributes {dimension_semantics = [#tpu.dimension_semantics<parallel>], iteration_bounds = array<i64: 2>, scalar_prefetch = 0 : i64, scratch_operands = 0 : i64, tpu.core_type = #tpu.core_type<tc>, window_params = [{transform_indices = @transform_0, window_bounds = array<i64: 128, 256>}, {pipeline_mode = #tpu.pipeline_mode<synchronous>, transform_indices = @transform_1, window_bounds = array<i64: 1, 256>}, {pipeline_mode = #tpu.pipeline_mode<synchronous>, transform_indices = @transform_2, window_bounds = array<i64: 256, 128>}, {pipeline_mode = #tpu.pipeline_mode<synchronous>, transform_indices = @transform_3, window_bounds = array<i64: 1, 128>}, {pipeline_mode = #tpu.pipeline_mode<synchronous>, transform_indices = @transform_4, window_bounds = array<i64: 128, 128>}, {pipeline_mode = #tpu.pipeline_mode<synchronous>, transform_indices = @transform_5, window_bounds = array<i64: 1, 128>}, {pipeline_mode = #tpu.pipeline_mode<synchronous>, transform_indices = @transform_6, window_bounds = array<i64: 128, 256>}, {pipeline_mode = #tpu.pipeline_mode<synchronous>, transform_indices = @transform_7, window_bounds = array<i64: 1, 256>}, {transform_indices = @transform_8, window_bounds = array<i64: 128, 512>}, {transform_indices = @transform_9, window_bounds = array<i64: 128, 1>}]} {
    %c0 = arith.constant 0 : index
    %c0_0 = arith.constant 0 : index
    %0 = vector.load %arg1[%c0, %c0_0] : memref<128x256xf32, #tpu.memory_space<vmem>>, vector<128x256xf32>
    %c0_1 = arith.constant 0 : index
    %c0_2 = arith.constant 0 : index
    %1 = vector.load %arg2[%c0_1, %c0_2] : memref<1x256xf32, #tpu.memory_space<vmem>>, vector<1x256xf32>
    %2 = vector.broadcast %1 : vector<1x256xf32> to vector<128x256xf32>
    %3 = arith.mulf %2, %0 : vector<128x256xf32>
    %4 = arith.subf %0, %3 : vector<128x256xf32>
    %5 = arith.truncf %0 : vector<128x256xf32> to vector<128x256xbf16>
    %c0_3 = arith.constant 0 : index
    %c0_4 = arith.constant 0 : index
    %6 = vector.load %arg3[%c0_3, %c0_4] : memref<256x128xbf16, #tpu.memory_space<vmem>>, vector<256x128xbf16>
    %cst = arith.constant dense<0.000000e+00> : vector<128x128xf32>
    %7 = tpu.matmul %5, %6, %cst {dimension_numbers = #tpu.dot_dimension_numbers<[1], [0], [0], [1], [0, 0, 1, 1], [], []>} : vector<128x256xbf16>, vector<256x128xbf16>, vector<128x128xf32> -> vector<128x128xf32>
    %c0_5 = arith.constant 0 : index
    %c0_6 = arith.constant 0 : index
    %8 = vector.load %arg4[%c0_5, %c0_6] : memref<1x128xf32, #tpu.memory_space<vmem>>, vector<1x128xf32>
    %9 = vector.broadcast %8 : vector<1x128xf32> to vector<128x128xf32>
    %10 = arith.addf %7, %9 : vector<128x128xf32>
    %11 = math.tanh %10 : vector<128x128xf32>
    %12 = arith.truncf %11 : vector<128x128xf32> to vector<128x128xbf16>
    %c0_7 = arith.constant 0 : index
    %c0_8 = arith.constant 0 : index
    %13 = vector.load %arg5[%c0_7, %c0_8] : memref<128x128xbf16, #tpu.memory_space<vmem>>, vector<128x128xbf16>
    %cst_9 = arith.constant dense<0.000000e+00> : vector<128x128xf32>
    %14 = tpu.matmul %12, %13, %cst_9 {dimension_numbers = #tpu.dot_dimension_numbers<[1], [0], [0], [1], [0, 0, 1, 1], [], []>} : vector<128x128xbf16>, vector<128x128xbf16>, vector<128x128xf32> -> vector<128x128xf32>
    %c0_10 = arith.constant 0 : index
    %c0_11 = arith.constant 0 : index
    %15 = vector.load %arg6[%c0_10, %c0_11] : memref<1x128xf32, #tpu.memory_space<vmem>>, vector<1x128xf32>
    %16 = vector.broadcast %15 : vector<1x128xf32> to vector<128x128xf32>
    %17 = arith.addf %14, %16 : vector<128x128xf32>
    %18 = math.tanh %17 : vector<128x128xf32>
    %19 = arith.truncf %18 : vector<128x128xf32> to vector<128x128xbf16>
    %c0_12 = arith.constant 0 : index
    %c0_13 = arith.constant 0 : index
    %20 = vector.load %arg7[%c0_12, %c0_13] : memref<128x256xbf16, #tpu.memory_space<vmem>>, vector<128x256xbf16>
    %cst_14 = arith.constant dense<0.000000e+00> : vector<128x256xf32>
    %21 = tpu.matmul %19, %20, %cst_14 {dimension_numbers = #tpu.dot_dimension_numbers<[1], [0], [0], [1], [0, 0, 1, 1], [], []>} : vector<128x128xbf16>, vector<128x256xbf16>, vector<128x256xf32> -> vector<128x256xf32>
    %c0_15 = arith.constant 0 : index
    %c0_16 = arith.constant 0 : index
    %22 = vector.load %arg8[%c0_15, %c0_16] : memref<1x256xf32, #tpu.memory_space<vmem>>, vector<1x256xf32>
    %23 = vector.broadcast %22 : vector<1x256xf32> to vector<128x256xf32>
    %24 = arith.addf %21, %23 : vector<128x256xf32>
    %25 = math.tanh %24 : vector<128x256xf32>
    %cst_17 = arith.constant 5.000000e-01 : f32
    %26 = vector.broadcast %cst_17 : f32 to vector<128x256xf32>
    %27 = arith.mulf %25, %26 : vector<128x256xf32>
    %cst_18 = arith.constant 5.000000e-01 : f32
    %28 = vector.broadcast %cst_18 : f32 to vector<128x256xf32>
    %29 = arith.addf %27, %28 : vector<128x256xf32>
    %30 = math.exp %29 : vector<128x256xf32>
    %31 = arith.mulf %4, %30 : vector<128x256xf32>
    %32 = arith.addf %31, %24 : vector<128x256xf32>
    %c0_19 = arith.constant 0 : index
    %c0_20 = arith.constant 0 : index
    %33 = vector.load %arg9[%c0_19, %c0_20] : memref<128x512xf32, #tpu.memory_space<vmem>>, vector<128x256xf32>
    tpu.vector_store %arg9[%c0_19, %c0_20], %3 {strides = array<i32>} : memref<128x512xf32, #tpu.memory_space<vmem>>, vector<128x256xf32>,
    %c0_21 = arith.constant 0 : index
    %c256 = arith.constant 256 : index
    %34 = vector.load %arg9[%c0_21, %c256] : memref<128x512xf32, #tpu.memory_space<vmem>>, vector<128x256xf32>
    tpu.vector_store %arg9[%c0_21, %c256], %32 {strides = array<i32>} : memref<128x512xf32, #tpu.memory_space<vmem>>, vector<128x256xf32>,
    %cst_22 = arith.constant dense<0.000000e+00> : vector<128xf32>
    %35 = vector.multi_reduction <add>, %29, %cst_22 [1] : vector<128x256xf32> to vector<128xf32>
    %36 = vector.shape_cast %35 : vector<128xf32> to vector<128x1xf32>
    %c0_23 = arith.constant 0 : index
    %c0_24 = arith.constant 0 : index
    %37 = vector.load %arg10[%c0_23, %c0_24] : memref<128x1xf32, #tpu.memory_space<vmem>>, vector<128x1xf32>
    tpu.vector_store %arg10[%c0_23, %c0_24], %36 {strides = array<i32>} : memref<128x1xf32, #tpu.memory_space<vmem>>, vector<128x1xf32>,
    return
  }
  func.func @transform_0(%arg0: i32) -> (i32, i32) {
    %c0_i32 = arith.constant 0 : i32
    %c0_i32_0 = arith.constant 0 : i32
    return %arg0, %c0_i32 : i32, i32
  }
  func.func @transform_1(%arg0: i32) -> (i32, i32) {
    %c0_i32 = arith.constant 0 : i32
    %c0_i32_0 = arith.constant 0 : i32
    %c0_i32_1 = arith.constant 0 : i32
    return %c0_i32, %c0_i32_0 : i32, i32
  }
  func.func @transform_2(%arg0: i32) -> (i32, i32) {
    %c0_i32 = arith.constant 0 : i32
    %c0_i32_0 = arith.constant 0 : i32
    %c0_i32_1 = arith.constant 0 : i32
    return %c0_i32, %c0_i32_0 : i32, i32
  }
  func.func @transform_3(%arg0: i32) -> (i32, i32) {
    %c0_i32 = arith.constant 0 : i32
    %c0_i32_0 = arith.constant 0 : i32
    %c0_i32_1 = arith.constant 0 : i32
    return %c0_i32, %c0_i32_0 : i32, i32
  }
  func.func @transform_4(%arg0: i32) -> (i32, i32) {
    %c0_i32 = arith.constant 0 : i32
    %c0_i32_0 = arith.constant 0 : i32
    %c0_i32_1 = arith.constant 0 : i32
    return %c0_i32, %c0_i32_0 : i32, i32
  }
  func.func @transform_5(%arg0: i32) -> (i32, i32) {
    %c0_i32 = arith.constant 0 : i32
    %c0_i32_0 = arith.constant 0 : i32
    %c0_i32_1 = arith.constant 0 : i32
    return %c0_i32, %c0_i32_0 : i32, i32
  }
  func.func @transform_6(%arg0: i32) -> (i32, i32) {
    %c0_i32 = arith.constant 0 : i32
    %c0_i32_0 = arith.constant 0 : i32
    %c0_i32_1 = arith.constant 0 : i32
    return %c0_i32, %c0_i32_0 : i32, i32
  }
  func.func @transform_7(%arg0: i32) -> (i32, i32) {
    %c0_i32 = arith.constant 0 : i32
    %c0_i32_0 = arith.constant 0 : i32
    %c0_i32_1 = arith.constant 0 : i32
    return %c0_i32, %c0_i32_0 : i32, i32
  }
  func.func @transform_8(%arg0: i32) -> (i32, i32) {
    %c0_i32 = arith.constant 0 : i32
    %c0_i32_0 = arith.constant 0 : i32
    return %arg0, %c0_i32 : i32, i32
  }
  func.func @transform_9(%arg0: i32) -> (i32, i32) {
    %c0_i32 = arith.constant 0 : i32
    %c0_i32_0 = arith.constant 0 : i32
    return %arg0, %c0_i32 : i32, i32
  }
}

</mosaic_0001>

<bundles_post_ra>
// kernel: tpu_custom_call.1
= control target key start
LH: loop header
LB: loop body
LE: loop exit
PB: predicated region body
PF: predicated region fallthrough
CT: control target
= control target key end

     0   :  { %s3406_s0 = inlined_call_operand.hbm [shape: f32[256,256], index: 0, kind: input, shape index: {}]   ;;  %s3407_s1 = inlined_call_operand.hbm [shape: f32[1,256], index: 1, kind: input, shape index: {}]   ;;  %s3408_s2 = inlined_call_operand.hbm [shape: bf16[256,128], index: 2, kind: input, shape index: {}]   ;;  %s3409_s3 = inlined_call_operand.vmem [shape: f32[1,128], index: 3, kind: input, shape index: {}]   ;;  %s3410_s4 = inlined_call_operand.hbm [shape: bf16[128,128], index: 4, kind: input, shape index: {}]   ;;  %s3411_s5 = inlined_call_operand.vmem [shape: f32[1,128], index: 5, kind: input, shape index: {}]   ;;  %s3412_s6 = inlined_call_operand.hbm [shape: bf16[128,256], index: 6, kind: input, shape index: {}]   ;;  %s3413_s7 = inlined_call_operand.vmem [shape: f32[1,256], index: 7, kind: input, shape index: {}]   ;;  %s3414_s8 = inlined_call_operand.hbm [shape: f32[256,512], index: 8, kind: output, shape index: {0}]   ;;  %s3415_s9 = inlined_call_operand.vmem [shape: f32[256,1], index: 9, kind: output, shape index: {1}]  }
   0x1   :  { %3440 = sst [smem:[#allocation40_spill]] %s3407_s1 }
   0x2   :  { %3441 = sst [smem:[#allocation41_spill]] %s3408_s2 }
   0x3   :  { %3442 = sst [smem:[#allocation42_spill]] %s3410_s4 }
   0x4   :  { %15 = vsyncpa [#allocation3], 0 }
   0x5   :  { %17 = vsyncpa [#allocation3 + $0x1], 0 }
   0x6   :  { %18 = vsyncpa [#allocation6], 0 }
   0x7   :  { %19 = vsyncpa [#allocation9], 0 }
   0x8   :  { %20 = vsyncpa [#allocation4], 0 }
   0x9   :  { %22 = vsyncpa [#allocation4 + $0x1], 0  ;;  %s2493_s30 = smov 0   ;;  %s2495_s10 = smov 0  }
   0xa   :  { %s2497_s11 = smov 0   ;;  %s2499_s12 = smov 0  }
   0xb LB: > { %s2514_s13 = sadd.s32 4294967295, %s2429_s12   ;;  %s1662_s14 = sadd.s32 4294967294, %s2429_s12   ;;  %s2429_s12 = sphi %s2499_s12, %s3535_s12   ;;  %s2425_s11 = sphi %s2497_s11, %s3534_s11   ;;  %s2421_s10 = sphi %s2495_s10, %s3533_s10   ;;  %s2417_s30 = sphi %s2493_s30, %s3532_s30  }
   0xc   : > { %p48_p0 = scmp.ne.s32.totalorder %s2421_s10, %s2417_s30  ;;  %p49_p1 = scmp.eq.s32.totalorder %s2514_s13, 0 }
   0xd   : > { %p219_p2 = scmp.eq.s32.totalorder %s2514_s13, 1  ;;  %p225_p3 = scmp.eq.s32.totalorder %s1662_s14, 1 }
   0xe   : > { %p2523_p4 = por %p49_p1, %p48_p0  ;;  %p1663_p5 = scmp.ge.s32.totalorder %s2429_s12, 1 }
   0xf   : > { %p2528_p6 = por %p225_p3, %p48_p0  ;;  %p258_p7 = scmp.lt.s32.totalorder %s2429_s12, 3 }
  0x10   : > { %s3445_s1 = sld [smem:[#allocation40_spill]]  ;;  %s2431_s21 = smov [#allocation5]  }
  0x11   : > { %p2536_p8 = pnand %p1663_p5, %p258_p7  ;;  %s272_s22 = sshll.u32 %s2431_s21, 4  ;;  %s273_s22 = int_to_ptr.vmem [resolvable:$true] %s272_s22 }
  0x12   : > { %s3448_s4 = sld [smem:[#allocation42_spill]]  ;;  %s2432_s27 = smov [#allocation8]  }
  0x13   : > { %p1936_p10 = pneg %p2536_p8  ;;  %s300_s28 = sshll.u32 %s2432_s27, 4  ;;  %s301_s28 = int_to_ptr.vmem [resolvable:$true] %s300_s28 }
  0x14   : > { %s3449_s2 = sld [smem:[#allocation41_spill]]  ;;  %s2433_s18 = smov 64  }
  0x15   : > { %p2545_p11 = pnand %p1936_p10, %p49_p1  ;;  %s2434_s21 = smov 4  }
  0x16   : > { %s270_s19 = sshll.u32 %s3445_s1, 4  ;;  %s2436_s29 = smov [#allocation10]   ;;  %s271_s19 = int_to_ptr.hbm [resolvable:$true] %s270_s19 }
  0x17   : > { %1939 = dma.hbm_to_vmem [thread:$0]  (!%p2545_p11), %s271_s19, 32, %s273_s22, [#allocation6]  }
  0x18   : > { %s298_s26 = sshll.u32 %s3448_s4, 4  ;;  %s315_s19 = sshll.u32 %s3412_s6, 4  ;;  %s299_s26 = int_to_ptr.hbm [resolvable:$true] %s298_s26  ;;  %s316_s19 = int_to_ptr.hbm [resolvable:$true] %s315_s19 }
  0x19   : > { %1945 = dma.hbm_to_vmem [thread:$0]  (!%p2545_p11), %s299_s26, 1024, %s301_s28, [#allocation9], %s2433_s18, %s2433_s18, %s2434_s21  }
  0x1a   : > { %s281_s17 = sshll.u32 %s3449_s2, 4  ;;  %s2435_s22 = smov [#allocation7]   ;;  %s282_s17 = int_to_ptr.hbm [resolvable:$true] %s281_s17 }
  0x1b   : > { %s283_s27 = sshll.u32 %s2435_s22, 4  ;;  %s317_s26 = sshll.u32 %s2436_s29, 4  ;;  %s284_s27 = int_to_ptr.vmem [resolvable:$true] %s283_s27  ;;  %s318_s26 = int_to_ptr.vmem [resolvable:$true] %s317_s26 }
  0x1c   : > { %1942 = dma.hbm_to_vmem [thread:$0]  (!%p2545_p11), %s282_s17, 2048, %s284_s27, [#allocation6], %s2433_s18, %s2433_s18, %s2434_s21  }
  0x1d   : > { %s2437_s28 = smov 128   ;;  %s2438_s14 = smov 8  }
  0x1e   : > { %1948 = dma.hbm_to_vmem [thread:$0]  (!%p2545_p11), %s316_s19, 2048, %s318_s26, [#allocation9], %s2437_s28, %s2437_s28, %s2438_s14  }
  0x1f   : > { %s2567_s24 = sadd.s32 1, %s2429_s12   ;;  %s35_s22 = sadd.s32 1, %s2425_s11 }
  0x20   : > { %s32_s25 = ssub.s32 %s2429_s12, %s2567_s24  ;;  %p42_p13 = scmp.ne.s32.totalorder %s2425_s11, %s2421_s10 }
  0x21   : > { %p33_p12 = scmp.eq.s32.totalorder %s32_s25, 0  ;;  %p43_p0 = scmp.eq.s32.totalorder %s2429_s12, 0 }
  0x22   : > { %p2580_p5 = por %p219_p2, %p42_p13  ;;  %p1961_p7 = scmp.lt.s32.totalorder %s2429_s12, 2 }
  0x23   : > { %s2576_s1 = scalar_select %p33_p12, %s2425_s11, %s35_s22  }
  0x24   : > { %p44_p3 = por %p43_p0, %p42_p13  ;;  %s334_s18 = sand.u32 1, %s2425_s11  }
  0x25   : > { %s1669_s23 = sshll.u32 %s334_s18, 8  ;;  %s1849_s21 = sshll.u32 %s2429_s12, 8 }
  0x26   : > { %s344_s29 = scalar_lea.hbm %s3406_s0, %s1849_s21  ;;  %s338_s26 = scalar_lea.vmem [#allocation2], %s1669_s23 }
  0x27   : > { %s347_s28 = sshll.u32 %s338_s26, 4  ;;  %s345_s14 = sshll.u32 %s344_s29, 4  ;;  %s348_s28 = int_to_ptr.vmem [resolvable:$true] %s347_s28  ;;  %s346_s14 = int_to_ptr.hbm [resolvable:$true] %s345_s14 }
  0x28   : > { %p2590_p10 = pnand %p1961_p7, %p44_p3  ;;  %s335_s22 = scalar_lea.sflag [#allocation3], %s334_s18 }
  0x29   : > { %s2325_s2 = sshra.s32 %s346_s14, 4  ;;  %s2332_s19 = scalar_lea.hbm %s3406_s0, 512  ;;  %s2326_s2 = int_to_ptr.hbm [resolvable:$true] %s2325_s2 }
  0x2a   : > { %s2327_s4 = scalar_lea.hbm %s2326_s2, 256  ;;  %p2329_p11 = pneg %p2590_p10 }
  0x2b   : > { %p2328_p2 = scmp.ne.s32.totalorder %s2326_s2, %s2327_s4  ;;  %p2333_p0 = scmp.lt.s32.totalorder %s2326_s2, %s3406_s0 }
  0x2c   : > { %p2334_p3 = scmp.lt.s32.totalorder %s2332_s19, %s2327_s4 }
  0x2d   : > { %p2330_p12 = pnand %p2329_p11, %p2328_p2 }
  0x2e   : > { %p2335_p7 = por %p2334_p3, %p2333_p0 }
  0x2f   : > { %p2331_p13 = pneg %p2330_p12 }
  0x31   : > { %p2336_p9 = pnand %p2335_p7, %p2331_p13 }
  0x33   : > { %2339 = shalt.err (!%p2336_p9)
}
  0x34   : > { %s2439_s18 = smov 256   ;;  %s2440_s26 = smov 16  }
  0x35   : > { %1952 = dma.hbm_to_vmem [thread:$0]  (!%p2590_p10), %s346_s14, 4096, %s348_s28, %s335_s22, %s2439_s18, %s2439_s18, %s2440_s26  }
  0x36   : > { %359 = sbr.rel (%p2536_p8) target bundleno = 811 (0x32b), region = 52 }
  0x3b   : > { %s2607_s21 = sand.u32 1, %s2421_s10  }
  0x3c   : > { %s1674_s23 = sshll.u32 %s2607_s21, 8  ;;  %s362_s2 = scalar_lea.sflag [#allocation3], %s2607_s21 }
  0x3d   : > { %s2611_s4 = scalar_lea.vmem [#allocation2], %s1674_s23 }
  0x3e   : > { %2400 = dma.done.wait (%p2523_p4), %s362_s2, 4096  }
  0x3f   : > { %2402 = vsyncadd (%p2523_p4), %s362_s2, 4294963200 }
  0x40   : > { %2404 = dma.done.wait (%p49_p1), [#allocation6], 2080  }
  0x41   : > { %2406 = vsyncadd (%p49_p1), [#allocation6], 4294965216 }
  0x42   : > { %2408 = dma.done.wait (%p49_p1), [#allocation9], 3072  }
  0x43   : > { %2410 = vsyncadd (%p49_p1), [#allocation9], 4294964224  ;;  %v1857_v0 = vld [vmem:[#allocation7 + $0x38] sm:$0xff]  ;;  %v1856_v1 = vld [vmem:[#allocation7 + $0x30] sm:$0xff]  ;;  %s1679_s15 = sshll.u32 %s2607_s21, 9  ;;  %s1680_s29 = sshll.u32 %s2514_s13, 4 }
  0x44   : > { %1892 = vmatpush.bf16.msra.mxu1 %v1857_v0  ;;  %684 = vmatpush.bf16.msra.mxu0 %v1857_v0  ;;  %v466_v2 = vld [vmem:[#allocation5] sm:$0x3]  ;;  %v2632_v5 = vld [vmem:[%s2611_s4 + $0x50] sm:$0xff]  ;;  %s2646_s20 = scalar_lea.vmem [#allocation11], %s1679_s15  ;;  %v1854_v11 = vld [vmem:[#allocation7 + $0x20] sm:$0xff]  ;;  %p429_p1 = scmp.lt.s32.totalorder %s1680_s29, 31 }
  0x45   : > { %1893 = vmatpush.bf16.msra.mxu2 %v1857_v0  ;;  %1894 = vmatpush.bf16.msra.mxu3 %v1857_v0  ;;  %v2626_v3 = vperm.slane %v466_v2, 0  ;;  %v2629_v4 = vld [vmem:[%s2611_s4 + $0x40] sm:$0xff]  ;;  %v1855_v6 = vld [vmem:[#allocation7 + $0x28] sm:$0xff]  ;;  %v1852_v19 = vld [vmem:[#allocation7 + $0x10] sm:$0xff]  ;;  %v2696_v29 = vperm.slane %v466_v2, 1  ;;  %vm1483_vm0 = vcmask 7168  }
  0x46   : > { %v2653_v12 = vld [vmem:[%s2611_s4 + $0x60] sm:$0xff]  ;;  %v2656_v13 = vld [vmem:[%s2611_s4 + $0x70] sm:$0xff]  ;;  %v2699_v30 = vld [vmem:[%s2611_s4 + $0x8] sm:$0xff]  ;;  %v540_v31 = vpack.c.bf16 %v2632_v5, %v2629_v4  ;;  %s3537_s29 = smov (!%p429_p1, %s1680_s29), 31  ;;  %s1501_s22 = scalar_lea.sflag [#allocation4], %s2607_s21 }
  0x47   : > { %v2636_v7 = vmul.f32 %v2626_v3, %v2629_v4  ;;  %v2640_v8 = vmul.f32 %v2626_v3, %v2632_v5  ;;  %v2660_v14 = vmul.f32 %v2626_v3, %v2653_v12  ;;  %v2664_v15 = vmul.f32 %v2626_v3, %v2656_v13  ;;  %v1853_v16 = vld [vmem:[#allocation7 + $0x18] sm:$0xff]  ;;  %v2678_v21 = vld [vmem:[%s2611_s4 + $0x10] sm:$0xff]  ;;  %v1850_v27 = vld [vmem:[#allocation7] sm:$0xff]  ;;  %s1681_s18 = sshll.u32 %s3537_s29, 3  ;;  %s2375_s26 = scalar_lea.hbm %s3414_s8, 1024 }
  0x48   : > { %1895 = vmatpush.bf16.msra.mxu1 %v1856_v1  ;;  %685 = vmatpush.bf16.msra.mxu0 %v1856_v1  ;;  %v2675_v20 = vld [vmem:[%s2611_s4] sm:$0xff]  ;;  %v2686_v23 = vmul.f32 %v2626_v3, %v2678_v21  ;;  %v1851_v24 = vld [vmem:[#allocation7 + $0x8] sm:$0xff]  ;;  %v2707_v33 = vmul.f32 %v2696_v29, %v2699_v30  ;;  %v1864_v34 = vld [vmem:[#allocation7 + $0x70] sm:$0xff]  ;;  %v542_v51 = vpack.c.bf16 %v2656_v13, %v2653_v12  ;;  %s3321_s2 = scalar_lea.vmem %s3415_s9, %s1681_s18 }
  0x49   : > { %1896 = vmatpush.bf16.msra.mxu2 %v1856_v1  ;;  %1897 = vmatpush.bf16.msra.mxu3 %v1856_v1  ;;  %1379 = vst [vmem:[%s2646_s20 + $0x80] sm:$0xff] %v2636_v7  ;;  %v2682_v22 = vmul.f32 %v2626_v3, %v2675_v20  ;;  %v1865_v28 = vld [vmem:[#allocation7 + $0x78] sm:$0xff]  ;;  %v536_v32 = vpack.c.bf16 %v2678_v21, %v2675_v20  ;;  %v2717_v37 = vld [vmem:[%s2611_s4 + $0x30] sm:$0xff]  ;;  %v2720_v38 = vld [vmem:[%s2611_s4 + $0x28] sm:$0xff] }
  0x4a   : > { %1381 = vst [vmem:[%s2646_s20 + $0xa0] sm:$0xff] %v2640_v8  ;;  %v2714_v36 = vld [vmem:[%s2611_s4 + $0x20] sm:$0xff]  ;;  %v2728_v40 = vmul.f32 %v2626_v3, %v2717_v37  ;;  %v2731_v41 = vld [vmem:[%s2611_s4 + $0x38] sm:$0xff]  ;;  %v2735_v42 = vmul.f32 %v2696_v29, %v2720_v38  ;;  %v1863_v43 = vld [vmem:[#allocation7 + $0x68] sm:$0xff] }
  0x4b   : > { %1383 = vst [vmem:[%s2646_s20 + $0xc0] sm:$0xff] %v2660_v14  ;;  %v2724_v39 = vmul.f32 %v2626_v3, %v2714_v36  ;;  %v2739_v44 = vmul.f32 %v2696_v29, %v2731_v41  ;;  %v1862_v49 = vld [vmem:[#allocation7 + $0x60] sm:$0xff]  ;;  %v1861_v50 = vld [vmem:[#allocation7 + $0x58] sm:$0xff]  ;;  %v538_v52 = vpack.c.bf16 %v2717_v37, %v2714_v36  ;;  %v1860_v53 = vld [vmem:[#allocation7 + $0x50] sm:$0xff] }
  0x4c   : > { %1898 = vmatpush.bf16.msra.mxu1 %v1855_v6  ;;  %686 = vmatpush.bf16.msra.mxu0 %v1855_v6  ;;  %1385 = vst [vmem:[%s2646_s20 + $0xe0] sm:$0xff] %v2664_v15  ;;  %v2762_v54 = vld [vmem:[%s2611_s4 + $0x48] sm:$0xff]  ;;  %v2765_v55 = vld [vmem:[%s2611_s4 + $0x58] sm:$0xff]  ;;  %v2789_v0 = vld [vmem:[%s2611_s4 + $0x80] sm:$0xff] }
  0x4d   : > { %1899 = vmatpush.bf16.msra.mxu2 %v1855_v6  ;;  %1900 = vmatpush.bf16.msra.mxu3 %v1855_v6  ;;  %1371 = vst [vmem:[%s2646_s20] sm:$0xff] %v2682_v22  ;;  %v2769_v56 = vmul.f32 %v2696_v29, %v2762_v54  ;;  %v2773_v57 = vmul.f32 %v2696_v29, %v2765_v55  ;;  %v1859_v58 = vld [vmem:[#allocation7 + $0x48] sm:$0xff]  ;;  %v1858_v61 = vld [vmem:[#allocation7 + $0x40] sm:$0xff]  ;;  %v2784_v62 = vld [vmem:[%s2611_s4 + $0x18] sm:$0xff] }
  0x4e   : > { %1373 = vst [vmem:[%s2646_s20 + $0x20] sm:$0xff] %v2686_v23  ;;  %v537_v63 = vpack.c.bf16 %v2784_v62, %v2699_v30  ;;  %v2792_v1 = vld [vmem:[%s2611_s4 + $0x90] sm:$0xff]  ;;  %v2795_v2 = vld [vmem:[%s2611_s4 + $0x68] sm:$0xff]  ;;  %v2799_v6 = vmul.f32 %v2626_v3, %v2789_v0  ;;  %v2935_v9 = vld [vmem:[%s2611_s4 + $0xe0] sm:$0xff] }
  0x4f   : > { %1372 = vst [vmem:[%s2646_s20 + $0x8] sm:$0xff] %v2707_v33  ;;  %v2938_v59 = vld [vmem:[%s2611_s4 + $0xf0] sm:$0xff]  ;;  %v2941_v48 = vld [vmem:[%s2611_s4 + $0xc8] sm:$0xff]  ;;  %v2945_v46 = vmul.f32 %v2626_v3, %v2935_v9  ;;  %v2954_v47 = vld [vmem:[%s2611_s4 + $0xd8] sm:$0xff] }
  0x50   : > { %1901 = vmatpush.bf16.msra.mxu1 %v1854_v11  ;;  %687 = vmatpush.bf16.msra.mxu0 %v1854_v11  ;;  %1375 = vst [vmem:[%s2646_s20 + $0x40] sm:$0xff] %v2724_v39  ;;  %v2949_v45 = vmul.f32 %v2626_v3, %v2938_v59  ;;  %v2958_v26 = vmul.f32 %v2696_v29, %v2941_v48  ;;  %v2983_v35 = vld [vmem:[%s2611_s4 + $0xe8] sm:$0xff] }
  0x51   : > { %1902 = vmatpush.bf16.msra.mxu2 %v1854_v11  ;;  %1903 = vmatpush.bf16.msra.mxu3 %v1854_v11  ;;  %1377 = vst [vmem:[%s2646_s20 + $0x60] sm:$0xff] %v2728_v40  ;;  %v2803_v11 = vmul.f32 %v2626_v3, %v2792_v1  ;;  %v2962_v25 = vmul.f32 %v2696_v29, %v2954_v47 }
  0x52   : > { %1376 = vst [vmem:[%s2646_s20 + $0x48] sm:$0xff] %v2735_v42 }
  0x53   : > { %1378 = vst [vmem:[%s2646_s20 + $0x68] sm:$0xff] %v2739_v44 }
  0x54   : > { %1904 = vmatpush.bf16.msra.mxu1 %v1853_v16  ;;  %688 = vmatpush.bf16.msra.mxu0 %v1853_v16  ;;  %1380 = vst [vmem:[%s2646_s20 + $0x88] sm:$0xff] %v2769_v56 }
  0x55   : > { %1905 = vmatpush.bf16.msra.mxu2 %v1853_v16  ;;  %1906 = vmatpush.bf16.msra.mxu3 %v1853_v16  ;;  %1382 = vst [vmem:[%s2646_s20 + $0xa8] sm:$0xff] %v2773_v57  ;;  %v544_v16 = vpack.c.bf16 %v2792_v1, %v2789_v0 }
  0x56   : > { %1387 = vst [vmem:[%s2646_s20 + $0x100] sm:$0xff] %v2799_v6 }
  0x57   : > { %1389 = vst [vmem:[%s2646_s20 + $0x120] sm:$0xff] %v2803_v11 }
  0x58   : > { %1907 = vmatpush.bf16.msra.mxu1 %v1852_v19  ;;  %689 = vmatpush.bf16.msra.mxu0 %v1852_v19  ;;  %3464 = vst [vmem:[#allocation28_spill] sm:$0xff] %v2935_v9 }
  0x59   : > { %1908 = vmatpush.bf16.msra.mxu2 %v1852_v19  ;;  %1909 = vmatpush.bf16.msra.mxu3 %v1852_v19  ;;  %v2808_v19 = vld [vmem:[%s2611_s4 + $0x78] sm:$0xff]  ;;  %3465 = vst [vmem:[#allocation29_spill] sm:$0xff] %v2938_v59 }
  0x5a   : > { %v543_v60 = vpack.c.bf16 %v2808_v19, %v2795_v2  ;;  %3466 = vst [vmem:[#allocation30_spill] sm:$0xff] %v2941_v48 }
  0x5b   : > { %3467 = vst [vmem:[#allocation31_spill] sm:$0xff] %v2945_v46 }
  0x5c   : > { %1910 = vmatpush.bf16.msra.mxu1 %v1851_v24  ;;  %690 = vmatpush.bf16.msra.mxu0 %v1851_v24  ;;  %3468 = vst [vmem:[#allocation32_spill] sm:$0xff] %v2949_v45 }
  0x5d   : > { %1911 = vmatpush.bf16.msra.mxu2 %v1851_v24  ;;  %1912 = vmatpush.bf16.msra.mxu3 %v1851_v24  ;;  %v2812_v24 = vmul.f32 %v2696_v29, %v2795_v2  ;;  %3469 = vst [vmem:[#allocation33_spill] sm:$0xff] %v2954_v47 }
  0x5e   : > { %3470 = vst [vmem:[#allocation34_spill] sm:$0xff] %v2958_v26 }
  0x5f   : > { %1384 = vst [vmem:[%s2646_s20 + $0xc8] sm:$0xff] %v2812_v24 }
  0x60   : > { %1913 = vmatpush.bf16.msra.mxu1 %v1850_v27  ;;  %691 = vmatpush.bf16.msra.mxu0 %v1850_v27  ;;  %3471 = vst [vmem:[#allocation35_spill] sm:$0xff] %v2962_v25 }
  0x61   : > { %1914 = vmatpush.bf16.msra.mxu2 %v1850_v27  ;;  %1915 = vmatpush.bf16.msra.mxu3 %v1850_v27  ;;  %v2816_v27 = vmul.f32 %v2696_v29, %v2808_v19  ;;  %1399 = vst [vmem:[%s2646_s20 + $0x1c0] sm:$0xff] %v2945_v46  ;;  %v1872_v46 = vld [vmem:[#allocation8 + $0x30] sm:$0xff] }
  0x62   : > { %1401 = vst [vmem:[%s2646_s20 + $0x1e0] sm:$0xff] %v2949_v45  ;;  %v1868_v45 = vld [vmem:[#allocation8 + $0x10] sm:$0xff] }
  0x63   : > { %702 = vmatmul.bf16.vlgmr.msra.gmra.mxu1 %v540_v31  ;;  %692 = vmatmul.bf16.vlgmr.msra.gmra.mxu0 %v536_v32  ;;  %1386 = vst [vmem:[%s2646_s20 + $0xe8] sm:$0xff] %v2816_v27  ;;  %v541_v31 = vpack.c.bf16 %v2765_v55, %v2762_v54 }
  0x64   : > { %733 = vmatpush.bf16.msrb.mxu1 %v1865_v28  ;;  %712 = vmatmul.bf16.vlgmr.msra.gmra.mxu2 %v544_v16  ;;  %v2891_v28 = vld [vmem:[%s2611_s4 + $0xa8] sm:$0xff]  ;;  %1396 = vst [vmem:[%s2646_s20 + $0x188] sm:$0xff] %v2958_v26 }
  0x65   : > { %3458 = vst [vmem:[#allocation22_spill] sm:$0xff] %v2891_v28  ;;  %v2908_v32 = vmul.f32 %v2696_v29, %v2891_v28 }
  0x66   : > { %1398 = vst [vmem:[%s2646_s20 + $0x1a8] sm:$0xff] %v2962_v25  ;;  %v549_v25 = vpack.c.bf16 %v2954_v47, %v2941_v48 }
  0x67   : > { %3462 = vst [vmem:[#allocation26_spill] sm:$0xff] %v2908_v32 }
  0x68   : > { %734 = vmatpush.bf16.msrb.mxu1 %v1864_v34  ;;  %1392 = vst [vmem:[%s2646_s20 + $0x148] sm:$0xff] %v2908_v32  ;;  %v1884_v32 = vld [vmem:[#allocation10 + $0x54] sm:$0xf] }
  0x69   : > { %3472 = vst [vmem:[#allocation36_spill] sm:$0xff] %v2983_v35 }
  0x6c   : > { %735 = vmatpush.bf16.msrb.mxu1 %v1863_v43  ;;  %v539_v43 = vpack.c.bf16 %v2731_v41, %v2720_v38 }
  0x70   : > { %736 = vmatpush.bf16.msrb.mxu1 %v1862_v49  ;;  %v2837_v49 = vld [vmem:[%s2611_s4 + $0xa0] sm:$0xff] }
  0x71   : > { %3452 = vst [vmem:[#allocation16_spill] sm:$0xff] %v2837_v49 }
  0x73   : > { %707 = vmatmul.bf16.gmra.mxu1 %v542_v51  ;;  %697 = vmatmul.bf16.gmra.mxu0 %v538_v52  ;;  %v2843_v51 = vld [vmem:[%s2611_s4 + $0x88] sm:$0xff]  ;;  %v2847_v52 = vmul.f32 %v2626_v3, %v2837_v49 }
  0x74   : > { %737 = vmatpush.bf16.msrb.mxu1 %v1861_v50  ;;  %v2840_v50 = vld [vmem:[%s2611_s4 + $0xb0] sm:$0xff] }
  0x75   : > { %3453 = vst [vmem:[#allocation17_spill] sm:$0xff] %v2840_v50 }
  0x76   : > { %3454 = vst [vmem:[#allocation18_spill] sm:$0xff] %v2847_v52 }
  0x77   : > { %1391 = vst [vmem:[%s2646_s20 + $0x140] sm:$0xff] %v2847_v52 }
  0x78   : > { %738 = vmatpush.bf16.msrb.mxu1 %v1860_v53  ;;  %v2851_v53 = vmul.f32 %v2626_v3, %v2840_v50 }
  0x7a   : > { %3455 = vst [vmem:[#allocation19_spill] sm:$0xff] %v2851_v53 }
  0x7b   : > { %1393 = vst [vmem:[%s2646_s20 + $0x160] sm:$0xff] %v2851_v53 }
  0x7c   : > { %739 = vmatpush.bf16.msrb.mxu1 %v1859_v58  ;;  %v546_v58 = vpack.c.bf16 %v2840_v50, %v2837_v49 }
  0x7e   : > { %717 = vmatmul.bf16.gmra.mxu2 %v546_v58  ;;  %v2885_v58 = vld [vmem:[%s2611_s4 + $0xc0] sm:$0xff] }
  0x7f   : > { %3456 = vst [vmem:[#allocation20_spill] sm:$0xff] %v2885_v58  ;;  %v2895_v18 = vmul.f32 %v2626_v3, %v2885_v58 }
  0x80   : > { %740 = vmatpush.bf16.msrb.mxu1 %v1858_v61  ;;  %v2856_v61 = vld [vmem:[%s2611_s4 + $0x98] sm:$0xff] }
  0x81   : > { %v2864_v16 = vmul.f32 %v2696_v29, %v2856_v61  ;;  %3459 = vst [vmem:[#allocation23_spill] sm:$0xff] %v2895_v18 }
  0x82   : > { %1395 = vst [vmem:[%s2646_s20 + $0x180] sm:$0xff] %v2895_v18 }
  0x83   : > { %741 = vmatmul.bf16.vlgmr.msrb.gmra.mxu1 %v537_v63  ;;  %v2860_v63 = vmul.f32 %v2696_v29, %v2843_v51  ;;  %1390 = vst [vmem:[%s2646_s20 + $0x128] sm:$0xff] %v2864_v16 }
  0x85   : > { %1388 = vst [vmem:[%s2646_s20 + $0x108] sm:$0xff] %v2860_v63 }
  0x93   : > { %746 = vmatmul.bf16.gmra.mxu1 %v539_v43  ;;  %v2888_v43 = vld [vmem:[%s2611_s4 + $0xd0] sm:$0xff] }
  0x94   : > { %3457 = vst [vmem:[#allocation21_spill] sm:$0xff] %v2888_v43  ;;  %v2899_v34 = vmul.f32 %v2626_v3, %v2888_v43  ;;  %v548_v17 = vpack.c.bf16 %v2888_v43, %v2885_v58  ;;  %v2990_v3 = vmul.f32 %v2696_v29, %v2983_v35  ;;  %v1869_v43 = vld [vmem:[#allocation8 + $0x18] sm:$0xff] }
  0x96   : > { %3460 = vst [vmem:[#allocation24_spill] sm:$0xff] %v2899_v34  ;;  %722 = vmatmul.bf16.vlgmr.msra.gmra.mxu3 %v548_v17  ;;  %v545_v17 = vpack.c.bf16 %v2856_v61, %v2843_v51 }
  0x97   : > { %1397 = vst [vmem:[%s2646_s20 + $0x1a0] sm:$0xff] %v2899_v34 }
  0x98   : > { %3474 = vst [vmem:[#allocation38_spill] sm:$0xff] %v2990_v3 }
  0x99   : > { %1400 = vst [vmem:[%s2646_s20 + $0x1c8] sm:$0xff] %v2990_v3  ;;  %v1867_v3 = vld [vmem:[#allocation8 + $0x8] sm:$0xff] }
  0xa3   : > { %751 = vmatmul.bf16.gmra.mxu1 %v541_v31  ;;  %v2904_v31 = vld [vmem:[%s2611_s4 + $0xb8] sm:$0xff] }
  0xa4   : > { %3461 = vst [vmem:[#allocation25_spill] sm:$0xff] %v2904_v31  ;;  %v2912_v10 = vmul.f32 %v2696_v29, %v2904_v31 }
  0xa6   : > { %3463 = vst [vmem:[#allocation27_spill] sm:$0xff] %v2912_v10 }
  0xa7   : > { %1394 = vst [vmem:[%s2646_s20 + $0x168] sm:$0xff] %v2912_v10 }
  0xb3   : > { %756 = vmatmul.bf16.gmra.mxu1 %v543_v60  ;;  %v550_v60 = vpack.c.bf16 %v2938_v59, %v2935_v9  ;;  %v1873_v59 = vld [vmem:[#allocation8 + $0x38] sm:$0xff]  ;;  %v1871_v9 = vld [vmem:[#allocation8 + $0x28] sm:$0xff] }
  0xb4   : > { %874 = vmatpush.bf16.msrb.mxu2 %v1873_v59 }
  0xb5   : > { %727 = vmatmul.bf16.gmra.mxu3 %v550_v60  ;;  %v2986_v60 = vld [vmem:[%s2611_s4 + $0xf8] sm:$0xff]  ;;  %s1891_s4 = sshll.u32 %s2514_s13, 9  ;;  %s1519_s13 = sshll.u32 %s2646_s20, 4  ;;  %s1520_s13 = int_to_ptr.vmem [resolvable:$true] %s1519_s13 }
  0xb6   : > { %3473 = vst [vmem:[#allocation37_spill] sm:$0xff] %v2986_v60  ;;  %v2994_v34 = vmul.f32 %v2696_v29, %v2986_v60  ;;  %v551_v59 = vpack.c.bf16 %v2986_v60, %v2983_v35  ;;  %s1518_s14 = scalar_lea.hbm %s3414_s8, %s1891_s4 }
  0xb7   : > { %s1521_s25 = sshll.u32 %s1518_s14, 4  ;;  %s1522_s25 = int_to_ptr.hbm [resolvable:$true] %s1521_s25 }
  0xb8   : > { %3475 = vst [vmem:[#allocation39_spill] sm:$0xff] %v2994_v34  ;;  %875 = vmatpush.bf16.msrb.mxu2 %v1872_v46  ;;  %v1866_v46 = vld [vmem:[#allocation8] sm:$0xff]  ;;  %s2369_s19 = sshra.s32 %s1522_s25, 4  ;;  %s2370_s19 = int_to_ptr.hbm [resolvable:$true] %s2369_s19 }
  0xb9   : > { %1402 = vst [vmem:[%s2646_s20 + $0x1e8] sm:$0xff] %v2994_v34  ;;  %s2371_s27 = scalar_lea.hbm %s2370_s19, 512  ;;  %p2376_p10 = scmp.lt.s32.totalorder %s2370_s19, %s3414_s8 }
  0xba   : > { %p2372_p4 = scmp.ne.s32.totalorder %s2370_s19, %s2371_s27  ;;  %p2377_p2 = scmp.lt.s32.totalorder %s2375_s26, %s2371_s27 }
  0xbc   : > { %876 = vmatpush.bf16.msrb.mxu2 %v1871_v9  ;;  %p2373_p8 = pnand %p2372_p4, %p2580_p5  ;;  %p2378_p11 = por %p2377_p2, %p2376_p10 }
  0xbe   : > { %p2374_p9 = pneg %p2373_p8 }
  0xc0   : > { %p2379_p12 = pnand %p2378_p11, %p2374_p9 }
  0xc3   : > { %761 = vmatmul.bf16.gmra.mxu1 %v545_v17  ;;  %v547_v17 = vpack.c.bf16 %v2904_v31, %v2891_v28  ;;  %v1822_v28 = vld [vmem:[#allocation10 + $0x58] sm:$0xf0] }
  0xd3   : > { %766 = vmatmul.bf16.gmra.mxu1 %v547_v17  ;;  %v1870_v17 = vld [vmem:[#allocation8 + $0x20] sm:$0xff] }
  0xd4   : > { %877 = vmatpush.bf16.msrb.mxu2 %v1870_v17 }
  0xd8   : > { %878 = vmatpush.bf16.msrb.mxu2 %v1869_v43 }
  0xdc   : > { %879 = vmatpush.bf16.msrb.mxu2 %v1868_v45 }
  0xe0   : > { %v703_v18 = vpop.f32.mrf.mxu1  ;;  %880 = vmatpush.bf16.msrb.mxu2 %v1867_v3  ;;  %v693_v9 = vpop.f32.mrf.mxu0 }
  0xe3   : > { %771 = vmatmul.bf16.gmra.mxu1 %v549_v25  ;;  %v3011_v25 = vld [vmem:[%s3409_s3] ss:$0 sm:$0xff] }
  0xe4   : > { %881 = vmatpush.bf16.msrb.mxu2 %v1866_v46  ;;  %v694_v45 = vadd.f32 %v3011_v25, %v693_v9 }
  0xe8   : > { %v705_v58 = vpop.f32.mrf.mxu1  ;;  %v695_v43 = vpop.f32.mrf.mxu0 }
  0xe9   : > { %v696_v3 = vadd.f32 %v3011_v25, %v695_v43 }
  0xf0   : > { %v708_v34 = vpop.f32.mrf.mxu1  ;;  %v698_v35 = vpop.f32.mrf.mxu0 }
  0xf1   : > { %v699_v50 = vadd.f32 %v3011_v25, %v698_v35  ;;  %v706_v35 = vadd.f32 %v3011_v25, %v705_v58 }
  0xf3   : > { %776 = vmatmul.bf16.gmra.mxu1 %v551_v59 }
  0xf8   : > { %v710_v47 = vpop.f32.mrf.mxu1  ;;  %v700_v31 = vpop.f32.mrf.mxu0 }
  0xf9   : > { %v701_v49 = vadd.f32 %v3011_v25, %v700_v31 }
 0x100   : > { %v742_v17 = vpop.f32.mrf.mxu1 }
 0x101   : > { %v743_v26 = vadd.f32 %v742_v17, %v694_v45 }
 0x103   : > { %2013 = vtanh.f32 %v743_v26 }
 0x108   : > { %v744_v48 = vpop.f32.mrf.mxu1 }
 0x109   : > { %v745_v60 = vadd.f32 %v744_v48, %v696_v3  ;;  %v2014_v59 = vpop.eup %2013 }
 0x10b   : > { %2015 = vtanh.f32 %v745_v60  ;;  %v704_v60 = vadd.f32 %v3011_v25, %v703_v18 }
 0x110   : > { %v747_v46 = vpop.f32.mrf.mxu1 }
 0x111   : > { %v2016_v53 = vpop.eup %2015  ;;  %v748_v52 = vadd.f32 %v747_v46, %v699_v50 }
 0x112   : > { %v798_v10 = vpack.c.bf16 %v2016_v53, %v2014_v59 }
 0x113   : > { %2017 = vtanh.f32 %v748_v52  ;;  %v709_v52 = vadd.f32 %v3011_v25, %v708_v34 }
 0x114   : > { %882 = vmatmul.bf16.vlgmr.msrb.gmra.mxu2 %v798_v10 }
 0x118   : > { %v749_v9 = vpop.f32.mrf.mxu1 }
 0x119   : > { %v750_v17 = vadd.f32 %v749_v9, %v701_v49  ;;  %v2018_v43 = vpop.eup %2017  ;;  %v713_v9 = vpop.f32.mrf.mxu2 }
 0x11b   : > { %2019 = vtanh.f32 %v750_v17  ;;  %v711_v17 = vadd.f32 %v3011_v25, %v710_v47 }
 0x120   : > { %v752_v48 = vpop.f32.mrf.mxu1 }
 0x121   : > { %v2020_v26 = vpop.eup %2019  ;;  %v753_v3 = vadd.f32 %v752_v48, %v704_v60  ;;  %v715_v48 = vpop.f32.mrf.mxu2  ;;  %v714_v60 = vadd.f32 %v3011_v25, %v713_v9 }
 0x122   : > { %v799_v45 = vpack.c.bf16 %v2020_v26, %v2018_v43  ;;  %v716_v34 = vadd.f32 %v3011_v25, %v715_v48  ;;  %v723_v9 = vpop.f32.mrf.mxu3 }
 0x123   : > { %2021 = vtanh.f32 %v753_v3 }
 0x124   : > { %887 = vmatmul.bf16.gmra.mxu2 %v799_v45 }
 0x128   : > { %v754_v53 = vpop.f32.mrf.mxu1 }
 0x129   : > { %v755_v59 = vadd.f32 %v754_v53, %v706_v35  ;;  %v2022_v10 = vpop.eup %2021 }
 0x12b   : > { %2023 = vtanh.f32 %v755_v59 }
 0x130   : > { %v757_v50 = vpop.f32.mrf.mxu1 }
 0x131   : > { %v2024_v31 = vpop.eup %2023  ;;  %v758_v46 = vadd.f32 %v757_v50, %v709_v52 }
 0x132   : > { %v800_v49 = vpack.c.bf16 %v2024_v31, %v2022_v10  ;;  %v718_v10 = vpop.f32.mrf.mxu2 }
 0x133   : > { %2025 = vtanh.f32 %v758_v46 }
 0x134   : > { %892 = vmatmul.bf16.gmra.mxu2 %v800_v49  ;;  %v719_v49 = vadd.f32 %v3011_v25, %v718_v10 }
 0x138   : > { %v759_v18 = vpop.f32.mrf.mxu1 }
 0x139   : > { %v760_v43 = vadd.f32 %v759_v18, %v711_v17  ;;  %v2026_v58 = vpop.eup %2025 }
 0x13a   : > { %v720_v46 = vpop.f32.mrf.mxu2 }
 0x13b   : > { %2027 = vtanh.f32 %v760_v43  ;;  %v721_v18 = vadd.f32 %v3011_v25, %v720_v46  ;;  %v1886_v46 = vld [vmem:[#allocation10 + $0x64] sm:$0xf] }
 0x140   : > { %v762_v26 = vpop.f32.mrf.mxu1 }
 0x141   : > { %v2028_v45 = vpop.eup %2027  ;;  %v763_v35 = vadd.f32 %v762_v26, %v714_v60  ;;  %v725_v26 = vpop.f32.mrf.mxu3 }
 0x142   : > { %v801_v3 = vpack.c.bf16 %v2028_v45, %v2026_v58 }
 0x143   : > { %2029 = vtanh.f32 %v763_v35 }
 0x144   : > { %897 = vmatmul.bf16.gmra.mxu2 %v801_v3  ;;  %v724_v3 = vadd.f32 %v3011_v25, %v723_v9 }
 0x148   : > { %v764_v53 = vpop.f32.mrf.mxu1 }
 0x149   : > { %v765_v59 = vadd.f32 %v764_v53, %v716_v34  ;;  %v2030_v47 = vpop.eup %2029  ;;  %v1836_v34 = vld [vmem:[#allocation10 + $0x70] sm:$0xf]  ;;  %v1889_v53 = vld [vmem:[#allocation10 + $0x74] sm:$0xf0] }
 0x14a   : > { %v1837_v10 = vor.u32 %v1889_v53, %v1836_v34  ;;  %v728_v34 = vpop.f32.mrf.mxu3 }
 0x14b   : > { %2031 = vtanh.f32 %v765_v59  ;;  %v1888_v59 = vld [vmem:[#allocation10 + $0x74] sm:$0xf] }
 0x14c   : > { %1049 = vmatpush.bf16.msrb.mxu3 %v1837_v10  ;;  %v729_v10 = vadd.f32 %v3011_v25, %v728_v34  ;;  %v1806_v34 = vld [vmem:[#allocation10 + $0x38] sm:$0xf0] }
 0x150   : > { %v767_v50 = vpop.f32.mrf.mxu1 }
 0x151   : > { %v2032_v31 = vpop.eup %2031  ;;  %v768_v17 = vadd.f32 %v767_v50, %v719_v49  ;;  %v1828_v50 = vld [vmem:[#allocation10 + $0x60] sm:$0xf] }
 0x152   : > { %v802_v52 = vpack.c.bf16 %v2032_v31, %v2030_v47  ;;  %v1838_v47 = vld [vmem:[#allocation10 + $0x78] sm:$0xf0]  ;;  %v1887_v31 = vld [vmem:[#allocation10 + $0x64] sm:$0xf0] }
 0x153   : > { %2033 = vtanh.f32 %v768_v17  ;;  %v1830_v17 = vld [vmem:[#allocation10 + $0x68] sm:$0xf0] }
 0x154   : > { %902 = vmatmul.bf16.gmra.mxu2 %v802_v52  ;;  %v1841_v52 = vor.u32 %v1888_v59, %v1838_v47  ;;  %v1833_v9 = vor.u32 %v1886_v46, %v1830_v17  ;;  %v1882_v46 = vld [vmem:[#allocation10 + $0x44] sm:$0xf] }
 0x156   : > { %1098 = vmatpush.bf16.msrb.mxu0 %v1841_v52  ;;  %v1883_v52 = vld [vmem:[#allocation10 + $0x44] sm:$0xf0] }
 0x158   : > { %v769_v43 = vpop.f32.mrf.mxu1 }
 0x159   : > { %v770_v58 = vadd.f32 %v769_v43, %v721_v18  ;;  %v2034_v48 = vpop.eup %2033  ;;  %v726_v18 = vadd.f32 %v3011_v25, %v725_v26  ;;  %v1829_v43 = vor.u32 %v1887_v31, %v1828_v50  ;;  %v730_v50 = vpop.f32.mrf.mxu3  ;;  %v1812_v31 = vld [vmem:[#allocation10 + $0x40] sm:$0xf] }
 0x15a   : > { %1099 = vmatpush.bf16.msrb.mxu0 %v1833_v9  ;;  %v1813_v17 = vor.u32 %v1883_v52, %v1812_v31  ;;  %v1804_v9 = vld [vmem:[#allocation10 + $0x30] sm:$0xf]  ;;  %v1877_v52 = vld [vmem:[#allocation10 + $0x14] sm:$0xf0] }
 0x15b   : > { %2035 = vtanh.f32 %v770_v58  ;;  %1050 = vmatpush.bf16.msrb.mxu3 %v1829_v43  ;;  %v731_v43 = vadd.f32 %v3011_v25, %v730_v50  ;;  %v1798_v25 = vld [vmem:[#allocation10 + $0x28] sm:$0xf0]  ;;  %v1788_v31 = vld [vmem:[#allocation10 + $0x10] sm:$0xf] }
 0x160   : > { %v772_v45 = vpop.f32.mrf.mxu1 }
 0x161   : > { %v2036_v60 = vpop.eup %2035  ;;  %v773_v49 = vadd.f32 %v772_v45, %v724_v3  ;;  %v1825_v3 = vor.u32 %v1884_v32, %v1822_v28 }
 0x162   : > { %v803_v35 = vpack.c.bf16 %v2036_v60, %v2034_v48  ;;  %v1820_v48 = vld [vmem:[#allocation10 + $0x50] sm:$0xf]  ;;  %v1885_v60 = vld [vmem:[#allocation10 + $0x54] sm:$0xf0] }
 0x163   : > { %2037 = vtanh.f32 %v773_v49  ;;  %v1821_v45 = vor.u32 %v1885_v60, %v1820_v48  ;;  %1100 = vmatpush.bf16.msrb.mxu0 %v1825_v3  ;;  %v1881_v48 = vld [vmem:[#allocation10 + $0x34] sm:$0xf0]  ;;  %v1880_v60 = vld [vmem:[#allocation10 + $0x34] sm:$0xf]  ;;  %v1796_v3 = vld [vmem:[#allocation10 + $0x20] sm:$0xf] }
 0x164   : > { %907 = vmatmul.bf16.gmra.mxu2 %v803_v35 }
 0x165   : > { %1051 = vmatpush.bf16.msrb.mxu3 %v1821_v45  ;;  %v1809_v45 = vor.u32 %v1880_v60, %v1806_v34  ;;  %v3032_v34 = vld [vmem:[%s3411_s5] ss:$0 sm:$0xff] }
 0x168   : > { %v774_v58 = vpop.f32.mrf.mxu1 }
 0x169   : > { %v775_v35 = vadd.f32 %v774_v58, %v726_v18  ;;  %v2038_v53 = vpop.eup %2037  ;;  %v1814_v18 = vld [vmem:[#allocation10 + $0x48] sm:$0xf0]  ;;  %1052 = vmatpush.bf16.msrb.mxu3 %v1813_v17  ;;  %v1789_v17 = vor.u32 %v1877_v52, %v1788_v31 }
 0x16a   : > { %v1817_v58 = vor.u32 %v1882_v46, %v1814_v18  ;;  %v1876_v46 = vld [vmem:[#allocation10 + $0x14] sm:$0xf]  ;;  %v1790_v18 = vld [vmem:[#allocation10 + $0x18] sm:$0xf0] }
 0x16b   : > { %2039 = vtanh.f32 %v775_v35  ;;  %v1805_v35 = vor.u32 %v1881_v48, %v1804_v9  ;;  %v1782_v48 = vld [vmem:[#allocation10 + $0x8] sm:$0xf0] }
 0x16c   : > { %1101 = vmatpush.bf16.msrb.mxu0 %v1817_v58  ;;  %v1780_v58 = vld [vmem:[#allocation10] sm:$0xf] }
 0x16d   : > { %1053 = vmatpush.bf16.msrb.mxu3 %v1805_v35 }
 0x170   : > { %v777_v26 = vpop.f32.mrf.mxu1  ;;  %1102 = vmatpush.bf16.msrb.mxu0 %v1809_v45 }
 0x171   : > { %v2040_v59 = vpop.eup %2039  ;;  %v778_v49 = vadd.f32 %v777_v26, %v729_v10  ;;  %v1878_v26 = vld [vmem:[#allocation10 + $0x24] sm:$0xf] }
 0x172   : > { %v804_v47 = vpack.c.bf16 %v2040_v59, %v2038_v53  ;;  %v1879_v53 = vld [vmem:[#allocation10 + $0x24] sm:$0xf0]  ;;  %v1801_v10 = vor.u32 %v1878_v26, %v1798_v25 }
 0x173   : > { %2041 = vtanh.f32 %v778_v49  ;;  %v1797_v59 = vor.u32 %v1879_v53, %v1796_v3 }
 0x174   : > { %912 = vmatmul.bf16.gmra.mxu2 %v804_v47  ;;  %1103 = vmatpush.bf16.msrb.mxu0 %v1801_v10 }
 0x175   : > { %1054 = vmatpush.bf16.msrb.mxu3 %v1797_v59 }
 0x178   : > { %v779_v28 = vpop.f32.mrf.mxu1 }
 0x179   : > { %v780_v32 = vadd.f32 %v779_v28, %v731_v43  ;;  %v2042_v47 = vpop.eup %2041  ;;  %v1793_v43 = vor.u32 %v1876_v46, %v1790_v18  ;;  %1055 = vmatpush.bf16.msrb.mxu3 %v1789_v17  ;;  %v1875_v28 = vld [vmem:[#allocation10 + $0x4] sm:$0xf0] }
 0x17a   : > { %v1781_v9 = vor.u32 %v1875_v28, %v1780_v58 }
 0x17b   : > { %2043 = vtanh.f32 %v780_v32  ;;  %1104 = vmatpush.bf16.msrb.mxu0 %v1793_v43  ;;  %v1874_v32 = vld [vmem:[#allocation10 + $0x4] sm:$0xf] }
 0x17c   : > { %v1785_v60 = vor.u32 %v1874_v32, %v1782_v48 }
 0x17d   : > { %1056 = vmatpush.bf16.msrb.mxu3 %v1781_v9 }
 0x17f   : > { %1105 = vmatpush.bf16.msrb.mxu0 %v1785_v60 }
 0x181   : > { %v2044_v50 = vpop.eup %2043 }
 0x182   : > { %v805_v49 = vpack.c.bf16 %v2044_v50, %v2042_v47 }
 0x184   : > { %917 = vmatmul.bf16.gmra.mxu2 %v805_v49 }
 0x197   : > { %v883_v35 = vpop.f32.mrf.mxu2 }
 0x198   : > { %v884_v45 = vadd.f32 %v3032_v34, %v883_v35 }
 0x19a   : > { %2045 = vtanh.f32 %v884_v45 }
 0x19f   : > { %v885_v3 = vpop.f32.mrf.mxu2 }
 0x1a0   : > { %v886_v53 = vadd.f32 %v3032_v34, %v885_v3  ;;  %v2046_v26 = vpop.eup %2045 }
 0x1a2   : > { %2047 = vtanh.f32 %v886_v53 }
 0x1a7   : > { %v888_v59 = vpop.f32.mrf.mxu2 }
 0x1a8   : > { %v2048_v25 = vpop.eup %2047  ;;  %v889_v47 = vadd.f32 %v3032_v34, %v888_v59 }
 0x1a9   : > { %v939_v10 = vpack.c.bf16 %v2048_v25, %v2046_v26 }
 0x1aa   : > { %2049 = vtanh.f32 %v889_v47 }
 0x1ab   : > { %1057 = vmatmul.bf16.vlgmr.msrb.gmra.mxu3 %v939_v10  ;;  %1106 = vmatmul.bf16.vlgmr.msrb.gmra.mxu0 %v939_v10 }
 0x1af   : > { %v890_v50 = vpop.f32.mrf.mxu2 }
 0x1b0   : > { %v891_v31 = vadd.f32 %v3032_v34, %v890_v50  ;;  %v2050_v52 = vpop.eup %2049 }
 0x1b2   : > { %2051 = vtanh.f32 %v891_v31 }
 0x1b7   : > { %v893_v46 = vpop.f32.mrf.mxu2 }
 0x1b8   : > { %v2052_v49 = vpop.eup %2051  ;;  %v894_v18 = vadd.f32 %v3032_v34, %v893_v46 }
 0x1b9   : > { %v940_v17 = vpack.c.bf16 %v2052_v49, %v2050_v52 }
 0x1ba   : > { %2053 = vtanh.f32 %v894_v18 }
 0x1bb   : > { %1062 = vmatmul.bf16.gmra.mxu3 %v940_v17  ;;  %1111 = vmatmul.bf16.gmra.mxu0 %v940_v17 }
 0x1bf   : > { %v895_v43 = vpop.f32.mrf.mxu2 }
 0x1c0   : > { %v896_v58 = vadd.f32 %v3032_v34, %v895_v43  ;;  %v2054_v28 = vpop.eup %2053 }
 0x1c2   : > { %2055 = vtanh.f32 %v896_v58 }
 0x1c7   : > { %v898_v32 = vpop.f32.mrf.mxu2 }
 0x1c8   : > { %v2056_v9 = vpop.eup %2055  ;;  %v899_v60 = vadd.f32 %v3032_v34, %v898_v32 }
 0x1c9   : > { %v941_v48 = vpack.c.bf16 %v2056_v9, %v2054_v28 }
 0x1ca   : > { %2057 = vtanh.f32 %v899_v60 }
 0x1cb   : > { %1067 = vmatmul.bf16.gmra.mxu3 %v941_v48  ;;  %1116 = vmatmul.bf16.gmra.mxu0 %v941_v48 }
 0x1cf   : > { %v900_v35 = vpop.f32.mrf.mxu2 }
 0x1d0   : > { %v901_v45 = vadd.f32 %v3032_v34, %v900_v35  ;;  %v2058_v3 = vpop.eup %2057 }
 0x1d2   : > { %2059 = vtanh.f32 %v901_v45 }
 0x1d7   : > { %v903_v53 = vpop.f32.mrf.mxu2 }
 0x1d8   : > { %v2060_v26 = vpop.eup %2059  ;;  %v904_v25 = vadd.f32 %v3032_v34, %v903_v53 }
 0x1d9   : > { %v942_v59 = vpack.c.bf16 %v2060_v26, %v2058_v3 }
 0x1da   : > { %2061 = vtanh.f32 %v904_v25 }
 0x1db   : > { %1072 = vmatmul.bf16.gmra.mxu3 %v942_v59  ;;  %1121 = vmatmul.bf16.gmra.mxu0 %v942_v59 }
 0x1df   : > { %v905_v10 = vpop.f32.mrf.mxu2 }
 0x1e0   : > { %v906_v47 = vadd.f32 %v3032_v34, %v905_v10  ;;  %v2062_v50 = vpop.eup %2061  ;;  %v3052_v10 = vmul.f32 %v2696_v29, %v2784_v62 }
 0x1e2   : > { %2063 = vtanh.f32 %v906_v47  ;;  %1374 = vst [vmem:[%s2646_s20 + $0x28] sm:$0xff] %v3052_v10 }
 0x1e7   : > { %v908_v31 = vpop.f32.mrf.mxu2 }
 0x1e8   : > { %v2064_v52 = vpop.eup %2063  ;;  %v909_v49 = vadd.f32 %v3032_v34, %v908_v31 }
 0x1e9   : > { %v943_v46 = vpack.c.bf16 %v2064_v52, %v2062_v50  ;;  %v963_v52 = vld [vmem:[%s3413_s7] sm:$0x3] }
 0x1ea   : > { %2065 = vtanh.f32 %v909_v49  ;;  %v3062_v29 = vperm.slane %v963_v52, 0 }
 0x1eb   : > { %1077 = vmatmul.bf16.gmra.mxu3 %v943_v46  ;;  %1126 = vmatmul.bf16.gmra.mxu0 %v943_v46  ;;  %v3059_v46 = vperm.slane %v963_v52, 1 }
 0x1ef   : > { %v910_v17 = vpop.f32.mrf.mxu2 }
 0x1f0   : > { %v911_v18 = vadd.f32 %v3032_v34, %v910_v17  ;;  %v2066_v43 = vpop.eup %2065 }
 0x1f2   : > { %2067 = vtanh.f32 %v911_v18 }
 0x1f7   : > { %v913_v58 = vpop.f32.mrf.mxu2 }
 0x1f8   : > { %v2068_v28 = vpop.eup %2067  ;;  %v914_v9 = vadd.f32 %v3032_v34, %v913_v58 }
 0x1f9   : > { %v944_v32 = vpack.c.bf16 %v2068_v28, %v2066_v43 }
 0x1fa   : > { %2069 = vtanh.f32 %v914_v9 }
 0x1fb   : > { %1082 = vmatmul.bf16.gmra.mxu3 %v944_v32  ;;  %1131 = vmatmul.bf16.gmra.mxu0 %v944_v32 }
 0x1ff   : > { %v915_v48 = vpop.f32.mrf.mxu2 }
 0x200   : > { %v916_v60 = vadd.f32 %v3032_v34, %v915_v48  ;;  %v2070_v35 = vpop.eup %2069 }
 0x202   : > { %2071 = vtanh.f32 %v916_v60 }
 0x207   : > { %v918_v45 = vpop.f32.mrf.mxu2 }
 0x208   : > { %v2072_v3 = vpop.eup %2071  ;;  %v919_v26 = vadd.f32 %v3032_v34, %v918_v45 }
 0x209   : > { %v945_v53 = vpack.c.bf16 %v2072_v3, %v2070_v35 }
 0x20a   : > { %2073 = vtanh.f32 %v919_v26 }
 0x20b   : > { %1087 = vmatmul.bf16.gmra.mxu3 %v945_v53  ;;  %1136 = vmatmul.bf16.gmra.mxu0 %v945_v53 }
 0x20f   : > { %v920_v59 = vpop.f32.mrf.mxu2 }
 0x210   : > { %v921_v25 = vadd.f32 %v3032_v34, %v920_v59  ;;  %v2074_v47 = vpop.eup %2073 }
 0x212   : > { %2075 = vtanh.f32 %v921_v25 }
 0x218   : > { %v2076_v50 = vpop.eup %2075 }
 0x219   : > { %v946_v31 = vpack.c.bf16 %v2076_v50, %v2074_v47 }
 0x21b   : > { %1092 = vmatmul.bf16.gmra.mxu3 %v946_v31  ;;  %1141 = vmatmul.bf16.gmra.mxu0 %v946_v31 }
 0x228   : > { %v1107_v34 = vpop.f32.mrf.mxu0 }
 0x229   : > { %v1108_v49 = vadd.f32 %v1107_v34, %v3059_v46 }
 0x22b   : > { %2077 = vtanh.f32 %v1108_v49 }
 0x22e   : > { %v1058_v17 = vpop.f32.mrf.mxu3 }
 0x22f   : > { %v1059_v18 = vadd.f32 %v1058_v17, %v3062_v29 }
 0x230   : > { %v1109_v43 = vpop.f32.mrf.mxu0 }
 0x231   : > { %v2078_v58 = vpop.eup %2077  ;;  %2079 = vtanh.f32 %v1059_v18  ;;  %v1110_v28 = vadd.f32 %v1109_v43, %v3059_v46 }
 0x232   : > { %v1180_v32 = vmul.f32 0.5, %v2078_v58 }
 0x233   : > { %2081 = vtanh.f32 %v1110_v28 }
 0x234   : > { %v1212_v9 = vadd.f32 0.5, %v1180_v32 }
 0x236   : > { %v1060_v48 = vpop.f32.mrf.mxu3  ;;  %v1245_v60 = vmul.f32 1.442695, %v1212_v9 }
 0x237   : > { %v2080_v35 = vpop.eup %2079  ;;  %v3067_v45 = vadd.f32 %v1060_v48, %v3062_v29  ;;  %v3476_v48 = vsub.f32 %v2699_v30, %v2707_v33 }
 0x238   : > { %v1112_v3 = vpop.f32.mrf.mxu0  ;;  %v1179_v53 = vmul.f32 0.5, %v2080_v35  ;;  %2083 = vpow2.f32 %v1245_v60 }
 0x239   : > { %v2082_v26 = vpop.eup %2081  ;;  %2085 = vtanh.f32 %v3067_v45  ;;  %v3071_v59 = vadd.f32 %v1112_v3, %v3059_v46 }
 0x23a   : > { %v1182_v25 = vmul.f32 0.5, %v2082_v26  ;;  %v1211_v47 = vadd.f32 0.5, %v1179_v53 }
 0x23b   : > { %2087 = vtanh.f32 %v3071_v59 }
 0x23c   : > { %v1214_v50 = vadd.f32 0.5, %v1182_v25  ;;  %v1435_v31 = vadd.f32 %v1212_v9, %v1211_v47  ;;  %v1243_v52 = vmul.f32 1.442695, %v1211_v47 }
 0x23e   : > { %v2084_v34 = vpop.eup %2083  ;;  %v1249_v17 = vmul.f32 1.442695, %v1214_v50  ;;  %v1063_v43 = vpop.f32.mrf.mxu3  ;;  %1436 = vadd.xlane.f32.xlu0 %v1435_v31  ;;  %2089 = vpow2.f32 %v1243_v52  ;;  %v507_v31 = vsub.f32 %v2784_v62, %v3052_v10 }
 0x23f   : > { %v2086_v58 = vpop.eup %2085  ;;  %v3075_v32 = vadd.f32 %v1063_v43, %v3062_v29  ;;  %v1308_v60 = vmul.f32 %v2084_v34, %v3476_v48 }
 0x240   : > { %2091 = vpow2.f32 %v1249_v17  ;;  %v1181_v35 = vmul.f32 0.5, %v2086_v58  ;;  %v1114_v3 = vpop.f32.mrf.mxu0  ;;  %v3477_v17 = vsub.f32 %v2675_v20, %v2682_v22 }
 0x241   : > { %v2088_v53 = vpop.eup %2087  ;;  %2093 = vtanh.f32 %v3075_v32  ;;  %v1340_v9 = vadd.f32 %v1308_v60, %v1108_v49  ;;  %v3082_v26 = vadd.f32 %v1114_v3, %v3059_v46 }
 0x242   : > { %v1213_v25 = vadd.f32 0.5, %v1181_v35  ;;  %v1184_v47 = vmul.f32 0.5, %v2088_v53 }
 0x243   : > { %1404 = vst [vmem:[%s2646_s20 + $0x18] sm:$0xff] %v1340_v9  ;;  %2095 = vtanh.f32 %v3082_v26 }
 0x244   : > { %v2090_v30 = vpop.eup %2089  ;;  %v1247_v33 = vmul.f32 1.442695, %v1213_v25  ;;  %v1438_v52 = vadd.f32 %v1214_v50, %v1213_v25  ;;  %v1216_v34 = vadd.f32 0.5, %v1184_v47 }
 0x245   : > { %v1307_v49 = vmul.f32 %v2090_v30, %v3477_v17 }
 0x246   : > { %v2092_v43 = vpop.eup %2091  ;;  %2097 = vpow2.f32 %v1247_v33  ;;  %v1065_v58 = vpop.f32.mrf.mxu3  ;;  %1439 = vadd.xlane.f32.xlu0 %v1438_v52  ;;  %v1253_v48 = vmul.f32 1.442695, %v1216_v34  ;;  %v3478_v33 = vsub.f32 %v2678_v21, %v2686_v23 }
 0x247   : > { %v2094_v60 = vpop.eup %2093  ;;  %v1310_v62 = vmul.f32 %v2092_v43, %v507_v31  ;;  %v1339_v10 = vadd.f32 %v1307_v49, %v1059_v18  ;;  %v3092_v35 = vadd.f32 %v1065_v58, %v3062_v29 }
 0x248   : > { %v1117_v3 = vpop.f32.mrf.mxu0  ;;  %v1183_v50 = vmul.f32 0.5, %v2094_v60  ;;  %2099 = vpow2.f32 %v1253_v48 }
 0x249   : > { %v2096_v53 = vpop.eup %2095  ;;  %v1342_v9 = vadd.f32 %v1310_v62, %v1110_v28  ;;  %1403 = vst [vmem:[%s2646_s20 + $0x10] sm:$0xff] %v1339_v10  ;;  %2101 = vtanh.f32 %v3092_v35  ;;  %v3097_v20 = vadd.f32 %v1117_v3, %v3059_v46 }
 0x24a   : > { %v1186_v22 = vmul.f32 0.5, %v2096_v53  ;;  %v1215_v25 = vadd.f32 0.5, %v1183_v50 }
 0x24b   : > { %1406 = vst [vmem:[%s2646_s20 + $0x38] sm:$0xff] %v1342_v9  ;;  %2103 = vtanh.f32 %v3097_v20 }
 0x24c   : > { %v2098_v18 = vpop.eup %2097  ;;  %v1218_v47 = vadd.f32 0.5, %v1186_v22  ;;  %v1441_v31 = vadd.f32 %v1216_v34, %v1215_v25  ;;  %v1251_v30 = vmul.f32 1.442695, %v1215_v25  ;;  %v3479_v34 = vsub.f32 %v2720_v38, %v2735_v42 }
 0x24d   : > { %v1309_v28 = vmul.f32 %v2098_v18, %v3478_v33  ;;  %v3480_v22 = vsub.f32 %v2714_v36, %v2724_v39  ;;  %v3481_v33 = vsub.f32 %v2731_v41, %v2739_v44 }
 0x24e   : > { %v2100_v52 = vpop.eup %2099  ;;  %v1257_v17 = vmul.f32 1.442695, %v1218_v47  ;;  %v1068_v49 = vpop.f32.mrf.mxu3  ;;  %1442 = vadd.xlane.f32.xlu1 %v1441_v31  ;;  %2105 = vpow2.f32 %v1251_v30 }
 0x24f   : > { %v2102_v43 = vpop.eup %2101  ;;  %v1341_v58 = vadd.f32 %v1309_v28, %v3067_v45  ;;  %v3106_v48 = vadd.f32 %v1068_v49, %v3062_v29  ;;  %v1312_v60 = vmul.f32 %v2100_v52, %v3479_v34 }
 0x250   : > { %2107 = vpow2.f32 %v1257_v17  ;;  %v1185_v62 = vmul.f32 0.5, %v2102_v43  ;;  %v1119_v21 = vpop.f32.mrf.mxu0 }
 0x251   : > { %v2104_v23 = vpop.eup %2103  ;;  %1405 = vst [vmem:[%s2646_s20 + $0x30] sm:$0xff] %v1341_v58  ;;  %2109 = vtanh.f32 %v3106_v48  ;;  %v1344_v10 = vadd.f32 %v1312_v60, %v3071_v59  ;;  %v3115_v3 = vadd.f32 %v1119_v21, %v3059_v46 }
 0x252   : > { %v1217_v45 = vadd.f32 0.5, %v1185_v62  ;;  %v1188_v50 = vmul.f32 0.5, %v2104_v23  ;;  %v3482_v62 = vsub.f32 %v2717_v37, %v2728_v40 }
 0x253   : > { %1408 = vst [vmem:[%s2646_s20 + $0x58] sm:$0xff] %v1344_v10  ;;  %2111 = vtanh.f32 %v3115_v3 }
 0x254   : > { %v2106_v53 = vpop.eup %2105  ;;  %v1255_v38 = vmul.f32 1.442695, %v1217_v45  ;;  %v1444_v42 = vadd.f32 %v1218_v47, %v1217_v45  ;;  %v1220_v9 = vadd.f32 0.5, %v1188_v50 }
 0x255   : > { %v1311_v25 = vmul.f32 %v2106_v53, %v3480_v22 }
 0x256   : > { %v2108_v18 = vpop.eup %2107  ;;  %2113 = vpow2.f32 %v1255_v38  ;;  %v1070_v59 = vpop.f32.mrf.mxu3  ;;  %1445 = vadd.xlane.f32.xlu1 %v1444_v42  ;;  %v1261_v31 = vmul.f32 1.442695, %v1220_v9  ;;  %v3483_v38 = vsub.f32 %v2762_v54, %v2769_v56 }
 0x257   : > { %v2110_v30 = vpop.eup %2109  ;;  %v1314_v28 = vmul.f32 %v2108_v18, %v3481_v33  ;;  %v1343_v52 = vadd.f32 %v1311_v25, %v3075_v32  ;;  %v3127_v47 = vadd.f32 %v1070_v59, %v3062_v29 }
 0x258   : > { %v1122_v17 = vpop.f32.mrf.mxu0  ;;  %v1187_v36 = vmul.f32 0.5, %v2110_v30  ;;  %2115 = vpow2.f32 %v1261_v31  ;;  %v3484_v30 = vsub.f32 %v2629_v4, %v2636_v7 }
 0x259   : > { %v2112_v39 = vpop.eup %2111  ;;  %v1346_v49 = vadd.f32 %v1314_v28, %v3082_v26  ;;  %1407 = vst [vmem:[%s2646_s20 + $0x50] sm:$0xff] %v1343_v52  ;;  %2117 = vtanh.f32 %v3127_v47  ;;  %v3133_v43 = vadd.f32 %v1122_v17, %v3059_v46 }
 0x25a   : > { %v1190_v58 = vmul.f32 0.5, %v2112_v39  ;;  %v1219_v41 = vadd.f32 0.5, %v1187_v36  ;;  %v3485_v36 = vsub.f32 %v2765_v55, %v2773_v57 }
 0x25b   : > { %1410 = vst [vmem:[%s2646_s20 + $0x78] sm:$0xff] %v1346_v49  ;;  %2119 = vtanh.f32 %v3133_v43 }
 0x25c   : > { %v2114_v44 = vpop.eup %2113  ;;  %v1222_v32 = vadd.f32 0.5, %v1190_v58  ;;  %v1447_v34 = vadd.f32 %v1220_v9, %v1219_v41  ;;  %v1259_v60 = vmul.f32 1.442695, %v1219_v41 }
 0x25d   : > { %v1313_v26 = vmul.f32 %v2114_v44, %v3482_v62 }
 0x25e   : > { %v2116_v21 = vpop.eup %2115  ;;  %v1265_v23 = vmul.f32 1.442695, %v1222_v32  ;;  %v1073_v10 = vpop.f32.mrf.mxu3  ;;  %1448 = vadd.xlane.f32.xlu2 %v1447_v34  ;;  %2121 = vpow2.f32 %v1259_v60 }
 0x25f   : > { %v2118_v45 = vpop.eup %2117  ;;  %v1345_v50 = vadd.f32 %v1313_v26, %v3092_v35  ;;  %v3142_v53 = vadd.f32 %v1073_v10, %v3062_v29  ;;  %v1316_v42 = vmul.f32 %v2116_v21, %v3483_v38  ;;  %v3486_v26 = vsub.f32 %v2632_v5, %v2640_v8 }
 0x260   : > { %2123 = vpow2.f32 %v1265_v23  ;;  %v1189_v9 = vmul.f32 0.5, %v2118_v45  ;;  %v1124_v37 = vpop.f32.mrf.mxu0  ;;  %v3487_v38 = vsub.f32 %v2795_v2, %v2812_v24 }
 0x261   : > { %v2120_v40 = vpop.eup %2119  ;;  %1409 = vst [vmem:[%s2646_s20 + $0x70] sm:$0xff] %v1345_v50  ;;  %2125 = vtanh.f32 %v3142_v53  ;;  %v1348_v22 = vadd.f32 %v1316_v42, %v3097_v20  ;;  %v3151_v25 = vadd.f32 %v1124_v37, %v3059_v46 }
 0x262   : > { %v1221_v35 = vadd.f32 0.5, %v1189_v9  ;;  %v1192_v18 = vmul.f32 0.5, %v2120_v40 }
 0x263   : > { %1412 = vst [vmem:[%s2646_s20 + $0x98] sm:$0xff] %v1348_v22  ;;  %2127 = vtanh.f32 %v3151_v25 }
 0x264   : > { %v2122_v59 = vpop.eup %2121  ;;  %v1263_v54 = vmul.f32 1.442695, %v1221_v35  ;;  %v1224_v56 = vadd.f32 0.5, %v1192_v18  ;;  %v1450_v31 = vadd.f32 %v1222_v32, %v1221_v35 }
 0x265   : > { %v1315_v33 = vmul.f32 %v2122_v59, %v3484_v30 }
 0x266   : > { %v2124_v28 = vpop.eup %2123  ;;  %2129 = vpow2.f32 %v1263_v54  ;;  %v1269_v20 = vmul.f32 1.442695, %v1224_v56  ;;  %v1075_v52 = vpop.f32.mrf.mxu3  ;;  %1451 = vadd.xlane.f32.xlu2 %v1450_v31  ;;  %v3488_v54 = vsub.f32 %v2653_v12, %v2660_v14 }
 0x267   : > { %v2126_v17 = vpop.eup %2125  ;;  %v1318_v39 = vmul.f32 %v2124_v28, %v3485_v36  ;;  %v1347_v49 = vadd.f32 %v1315_v33, %v3106_v48  ;;  %v3163_v58 = vadd.f32 %v1075_v52, %v3062_v29 }
 0x268   : > { %2131 = vpow2.f32 %v1269_v20  ;;  %v1191_v4 = vmul.f32 0.5, %v2126_v17  ;;  %v1127_v7 = vpop.f32.mrf.mxu0  ;;  %v3489_v20 = vsub.f32 %v2808_v19, %v2816_v27 }
 0x269   : > { %v2128_v41 = vpop.eup %2127  ;;  %v1350_v44 = vadd.f32 %v1318_v39, %v3115_v3  ;;  %1411 = vst [vmem:[%s2646_s20 + $0x90] sm:$0xff] %v1347_v49  ;;  %2133 = vtanh.f32 %v3163_v58  ;;  %v3169_v32 = vadd.f32 %v1127_v7, %v3059_v46 }
 0x26a   : > { %v1223_v34 = vadd.f32 0.5, %v1191_v4  ;;  %v1194_v55 = vmul.f32 0.5, %v2128_v41 }
 0x26b   : > { %1414 = vst [vmem:[%s2646_s20 + $0xb8] sm:$0xff] %v1350_v44  ;;  %2135 = vtanh.f32 %v3169_v32  ;;  %v3490_v44 = vsub.f32 %v2656_v13, %v2664_v15 }
 0x26c   : > { %v2130_v57 = vpop.eup %2129  ;;  %v1267_v48 = vmul.f32 1.442695, %v1223_v34  ;;  %v1226_v60 = vadd.f32 0.5, %v1194_v55  ;;  %v1453_v62 = vadd.f32 %v1224_v56, %v1223_v34 }
 0x26d   : > { %v1317_v3 = vmul.f32 %v2130_v57, %v3486_v26 }
 0x26e   : > { %v2132_v21 = vpop.eup %2131  ;;  %2137 = vpow2.f32 %v1267_v48  ;;  %v1273_v23 = vmul.f32 1.442695, %v1226_v60  ;;  %v1078_v10 = vpop.f32.mrf.mxu3  ;;  %1454 = vadd.xlane.f32.xlu0 %v1453_v62  ;;  %v3491_v62 = vsub.f32 %v2843_v51, %v2860_v63 }
 0x26f   : > { %v2134_v45 = vpop.eup %2133  ;;  %v1349_v50 = vadd.f32 %v1317_v3, %v3127_v47  ;;  %v1320_v42 = vmul.f32 %v2132_v21, %v3487_v38  ;;  %v3181_v9 = vadd.f32 %v1078_v10, %v3062_v29 }
 0x270   : > { %2139 = vpow2.f32 %v1273_v23  ;;  %v1193_v37 = vmul.f32 0.5, %v2134_v45  ;;  %v1129_v5 = vpop.f32.mrf.mxu0 }
 0x271   : > { %v2136_v8 = vpop.eup %2135  ;;  %1413 = vst [vmem:[%s2646_s20 + $0xb0] sm:$0xff] %v1349_v50  ;;  %v1352_v40 = vadd.f32 %v1320_v42, %v3133_v43  ;;  %2141 = vtanh.f32 %v3181_v9  ;;  %v3187_v22 = vadd.f32 %v1129_v5, %v3059_v46  ;;  %v3492_v42 = vsub.f32 %v2789_v0, %v2799_v6 }
 0x272   : > { %v1225_v47 = vadd.f32 0.5, %v1193_v37  ;;  %v1196_v35 = vmul.f32 0.5, %v2136_v8 }
 0x273   : > { %1416 = vst [vmem:[%s2646_s20 + $0xd8] sm:$0xff] %v1352_v40  ;;  %2143 = vtanh.f32 %v3187_v22 }
 0x274   : > { %v2138_v2 = vpop.eup %2137  ;;  %v1271_v24 = vmul.f32 1.442695, %v1225_v47  ;;  %v1228_v18 = vadd.f32 0.5, %v1196_v35  ;;  %v1456_v59 = vadd.f32 %v1226_v60, %v1225_v47  ;;  %v3493_v35 = vsub.f32 %v2856_v61, %v2864_v16 }
 0x275   : > { %v1319_v56 = vmul.f32 %v2138_v2, %v3488_v54 }
 0x276   : > { %v2140_v43 = vpop.eup %2139  ;;  %2145 = vpow2.f32 %v1271_v24  ;;  %v1277_v31 = vmul.f32 1.442695, %v1228_v18  ;;  %v1080_v30 = vpop.f32.mrf.mxu3  ;;  %1457 = vadd.xlane.f32.xlu1 %v1456_v59 }
 0x277   : > { %v2142_v33 = vpop.eup %2141  ;;  %v1351_v28 = vadd.f32 %v1319_v56, %v3142_v53  ;;  %v1322_v52 = vmul.f32 %v2140_v43, %v3489_v20  ;;  %v3199_v17 = vadd.f32 %v1080_v30, %v3062_v29  ;;  %v3494_v30 = vsub.f32 %v2792_v1, %v2803_v11 }
 0x278   : > { %2147 = vpow2.f32 %v1277_v31  ;;  %v1195_v36 = vmul.f32 0.5, %v2142_v33  ;;  %v1132_v12 = vpop.f32.mrf.mxu0 }
 0x279   : > { %v2144_v14 = vpop.eup %2143  ;;  %1415 = vst [vmem:[%s2646_s20 + $0xd0] sm:$0xff] %v1351_v28  ;;  %v1354_v39 = vadd.f32 %v1322_v52, %v3151_v25  ;;  %2149 = vtanh.f32 %v3199_v17  ;;  %v3205_v49 = vadd.f32 %v1132_v12, %v3059_v46  ;;  %v3495_v12 = vld [vmem:[#allocation22_spill] sm:$0xff] }
 0x27a   : > { %v1227_v53 = vadd.f32 0.5, %v1195_v36  ;;  %v1198_v4 = vmul.f32 0.5, %v2144_v14  ;;  %v3496_v14 = vld [vmem:[#allocation26_spill] sm:$0xff] }
 0x27b   : > { %1418 = vst [vmem:[%s2646_s20 + $0xf8] sm:$0xff] %v1354_v39  ;;  %2151 = vtanh.f32 %v3205_v49  ;;  %v3497_v39 = vsub.f32 %v3495_v12, %v3496_v14 }
 0x27c   : > { %v2146_v19 = vpop.eup %2145  ;;  %v1275_v27 = vmul.f32 1.442695, %v1227_v53  ;;  %v1230_v7 = vadd.f32 0.5, %v1198_v4  ;;  %v1459_v41 = vadd.f32 %v1228_v18, %v1227_v53 }
 0x27d   : > { %v1321_v34 = vmul.f32 %v2146_v19, %v3490_v44 }
 0x27e   : > { %v2148_v25 = vpop.eup %2147  ;;  %2153 = vpow2.f32 %v1275_v27  ;;  %v1281_v55 = vmul.f32 1.442695, %v1230_v7  ;;  %v1083_v57 = vpop.f32.mrf.mxu3  ;;  %1460 = vadd.xlane.f32.xlu2 %v1459_v41 }
 0x27f   : > { %v2150_v48 = vpop.eup %2149  ;;  %v1353_v60 = vadd.f32 %v1321_v34, %v3163_v58  ;;  %v1324_v26 = vmul.f32 %v2148_v25, %v3491_v62  ;;  %v3217_v3 = vadd.f32 %v1083_v57, %v3062_v29  ;;  %v3498_v57 = vld [vmem:[#allocation16_spill] sm:$0xff] }
 0x280   : > { %2155 = vpow2.f32 %v1281_v55  ;;  %v1197_v21 = vmul.f32 0.5, %v2150_v48  ;;  %v1134_v13 = vpop.f32.mrf.mxu0  ;;  %v3499_v48 = vld [vmem:[#allocation18_spill] sm:$0xff] }
 0x281   : > { %v2152_v15 = vpop.eup %2151  ;;  %1417 = vst [vmem:[%s2646_s20 + $0xf0] sm:$0xff] %v1353_v60  ;;  %v1356_v23 = vadd.f32 %v1324_v26, %v3169_v32  ;;  %2157 = vtanh.f32 %v3217_v3  ;;  %v3223_v10 = vadd.f32 %v1134_v13, %v3059_v46  ;;  %v3500_v60 = vsub.f32 %v3498_v57, %v3499_v48 }
 0x282   : > { %v1229_v58 = vadd.f32 0.5, %v1197_v21  ;;  %v1200_v45 = vmul.f32 0.5, %v2152_v15 }
 0x283   : > { %1420 = vst [vmem:[%s2646_s20 + $0x118] sm:$0xff] %v1356_v23  ;;  %2159 = vtanh.f32 %v3223_v10  ;;  %v3501_v23 = vld [vmem:[#allocation25_spill] sm:$0xff] }
 0x284   : > { %v2154_v51 = vpop.eup %2153  ;;  %v1279_v63 = vmul.f32 1.442695, %v1229_v58  ;;  %v1232_v50 = vadd.f32 0.5, %v1200_v45  ;;  %v1462_v38 = vadd.f32 %v1230_v7, %v1229_v58  ;;  %v3502_v58 = vld [vmem:[#allocation27_spill] sm:$0xff] }
 0x285   : > { %v1323_v37 = vmul.f32 %v2154_v51, %v3492_v42  ;;  %v3503_v45 = vsub.f32 %v3501_v23, %v3502_v58 }
 0x286   : > { %v2156_v32 = vpop.eup %2155  ;;  %2161 = vpow2.f32 %v1279_v63  ;;  %v1285_v5 = vmul.f32 1.442695, %v1232_v50  ;;  %v1085_v8 = vpop.f32.mrf.mxu3  ;;  %1463 = vadd.xlane.f32.xlu0 %v1462_v38 }
 0x287   : > { %v2158_v40 = vpop.eup %2157  ;;  %v1355_v47 = vadd.f32 %v1323_v37, %v3181_v9  ;;  %v1326_v2 = vmul.f32 %v2156_v32, %v3493_v35  ;;  %v3235_v24 = vadd.f32 %v1085_v8, %v3062_v29 }
 0x288   : > { %2163 = vpow2.f32 %v1285_v5  ;;  %v1199_v18 = vmul.f32 0.5, %v2158_v40  ;;  %v1137_v0 = vpop.f32.mrf.mxu0 }
 0x289   : > { %v2160_v6 = vpop.eup %2159  ;;  %1419 = vst [vmem:[%s2646_s20 + $0x110] sm:$0xff] %v1355_v47  ;;  %v1358_v59 = vadd.f32 %v1326_v2, %v3187_v22  ;;  %2165 = vtanh.f32 %v3235_v24  ;;  %v3241_v54 = vadd.f32 %v1137_v0, %v3059_v46  ;;  %v3504_v2 = vld [vmem:[#allocation17_spill] sm:$0xff] }
 0x28a   : > { %v1231_v9 = vadd.f32 0.5, %v1199_v18  ;;  %v1202_v56 = vmul.f32 0.5, %v2160_v6  ;;  %v3505_v18 = vld [vmem:[#allocation19_spill] sm:$0xff] }
 0x28b   : > { %1422 = vst [vmem:[%s2646_s20 + $0x138] sm:$0xff] %v1358_v59  ;;  %2167 = vtanh.f32 %v3241_v54  ;;  %v3506_v0 = vsub.f32 %v3504_v2, %v3505_v18 }
 0x28c   : > { %v2162_v61 = vpop.eup %2161  ;;  %v1283_v16 = vmul.f32 1.442695, %v1231_v9  ;;  %v1234_v43 = vadd.f32 0.5, %v1202_v56  ;;  %v1465_v31 = vadd.f32 %v1232_v50, %v1231_v9 }
 0x28d   : > { %v1325_v33 = vmul.f32 %v2162_v61, %v3494_v30 }
 0x28e   : > { %v2164_v22 = vpop.eup %2163  ;;  %2169 = vpow2.f32 %v1283_v16  ;;  %v1289_v28 = vmul.f32 1.442695, %v1234_v43  ;;  %v1088_v20 = vpop.f32.mrf.mxu3  ;;  %1466 = vadd.xlane.f32.xlu1 %v1465_v31  ;;  %v3507_v16 = vld [vmem:[#allocation30_spill] sm:$0xff] }
 0x28f   : > { %v2166_v52 = vpop.eup %2165  ;;  %v1357_v36 = vadd.f32 %v1325_v33, %v3199_v17  ;;  %v1328_v53 = vmul.f32 %v2164_v22, %v3497_v39  ;;  %v3253_v4 = vadd.f32 %v1088_v20, %v3062_v29 }
 0x290   : > { %2171 = vpow2.f32 %v1289_v28  ;;  %v1201_v19 = vmul.f32 0.5, %v2166_v52  ;;  %v1139_v1 = vpop.f32.mrf.mxu0 }
 0x291   : > { %v2168_v11 = vpop.eup %2167  ;;  %1421 = vst [vmem:[%s2646_s20 + $0x130] sm:$0xff] %v1357_v36  ;;  %v1360_v27 = vadd.f32 %v1328_v53, %v3205_v49  ;;  %2173 = vtanh.f32 %v3253_v4  ;;  %v3259_v7 = vadd.f32 %v1139_v1, %v3059_v46  ;;  %v3510_v1 = vld [vmem:[#allocation20_spill] sm:$0xff] }
 0x292   : > { %v1233_v17 = vadd.f32 0.5, %v1201_v19  ;;  %v1204_v41 = vmul.f32 0.5, %v2168_v11  ;;  %v3511_v11 = vld [vmem:[#allocation23_spill] sm:$0xff] }
 0x293   : > { %1424 = vst [vmem:[%s2646_s20 + $0x158] sm:$0xff] %v1360_v27  ;;  %2175 = vtanh.f32 %v3259_v7 }
 0x294   : > { %v2170_v44 = vpop.eup %2169  ;;  %v1287_v34 = vmul.f32 1.442695, %v1233_v17  ;;  %v1236_v25 = vadd.f32 0.5, %v1204_v41  ;;  %v1468_v55 = vadd.f32 %v1234_v43, %v1233_v17  ;;  %v3508_v43 = vld [vmem:[#allocation34_spill] sm:$0xff] }
 0x295   : > { %v1327_v62 = vmul.f32 %v2170_v44, %v3500_v60  ;;  %v3509_v31 = vsub.f32 %v3507_v16, %v3508_v43  ;;  %v3525_v16 = vld [vmem:[#allocation37_spill] sm:$0xff]  ;;  %v3526_v43 = vld [vmem:[#allocation39_spill] sm:$0xff] }
 0x296   : > { %v2172_v49 = vpop.eup %2171  ;;  %2177 = vpow2.f32 %v1287_v34  ;;  %v1293_v26 = vmul.f32 1.442695, %v1236_v25  ;;  %v1090_v21 = vpop.f32.mrf.mxu3  ;;  %1469 = vadd.xlane.f32.xlu2 %v1468_v55  ;;  %v3514_v55 = vld [vmem:[#allocation35_spill] sm:$0xff] }
 0x297   : > { %v2174_v13 = vpop.eup %2173  ;;  %v1359_v15 = vadd.f32 %v1327_v62, %v3217_v3  ;;  %v1330_v51 = vmul.f32 %v2172_v49, %v3503_v45  ;;  %v3271_v63 = vadd.f32 %v1090_v21, %v3062_v29  ;;  %v3516_v45 = vld [vmem:[#allocation21_spill] sm:$0xff] }
 0x298   : > { %2179 = vpow2.f32 %v1293_v26  ;;  %v1203_v50 = vmul.f32 0.5, %v2174_v13  ;;  %v1142_v38 = vpop.f32.mrf.mxu0 }
 0x299   : > { %v2176_v42 = vpop.eup %2175  ;;  %1423 = vst [vmem:[%s2646_s20 + $0x150] sm:$0xff] %v1359_v15  ;;  %v1362_v37 = vadd.f32 %v1330_v51, %v3223_v10  ;;  %2181 = vtanh.f32 %v3271_v63  ;;  %v3277_v32 = vadd.f32 %v1142_v38, %v3059_v46  ;;  %v3517_v51 = vld [vmem:[#allocation24_spill] sm:$0xff] }
 0x29a   : > { %v1235_v3 = vadd.f32 0.5, %v1203_v50  ;;  %v1206_v5 = vmul.f32 0.5, %v2176_v42 }
 0x29b   : > { %1426 = vst [vmem:[%s2646_s20 + $0x178] sm:$0xff] %v1362_v37  ;;  %2183 = vtanh.f32 %v3277_v32 }
 0x29c   : > { %v2178_v8 = vpop.eup %2177  ;;  %v1291_v40 = vmul.f32 1.442695, %v1235_v3  ;;  %v1238_v47 = vadd.f32 0.5, %v1206_v5  ;;  %v1471_v35 = vadd.f32 %v1236_v25, %v1235_v3  ;;  %v3513_v25 = vld [vmem:[#allocation33_spill] sm:$0xff]  ;;  %v3519_v3 = vld [vmem:[#allocation36_spill] sm:$0xff]  ;;  %v3520_v5 = vld [vmem:[#allocation38_spill] sm:$0xff] }
 0x29d   : > { %v1329_v6 = vmul.f32 %v2178_v8, %v3506_v0  ;;  %v3515_v57 = vsub.f32 %v3513_v25, %v3514_v55  ;;  %v3521_v8 = vsub.f32 %v3519_v3, %v3520_v5 }
 0x29e   : > { %v2180_v10 = vpop.eup %2179  ;;  %2185 = vpow2.f32 %v1291_v40  ;;  %v1297_v59 = vmul.f32 1.442695, %v1238_v47  ;;  %v1093_v9 = vpop.f32.mrf.mxu3  ;;  %1472 = vadd.xlane.f32.xlu0 %v1471_v35 }
 0x29f   : > { %v2182_v56 = vpop.eup %2181  ;;  %v1361_v61 = vadd.f32 %v1329_v6, %v3235_v24  ;;  %v1332_v30 = vmul.f32 %v2180_v10, %v3509_v31  ;;  %v3289_v33 = vadd.f32 %v1093_v9, %v3062_v29  ;;  %v3522_v10 = vld [vmem:[#allocation28_spill] sm:$0xff]  ;;  %v3527_v31 = vsub.f32 %v3525_v16, %v3526_v43 }
 0x2a0   : > { %2187 = vpow2.f32 %v1297_v59  ;;  %v1205_v22 = vmul.f32 0.5, %v2182_v56  ;;  %v1144_v28 = vpop.f32.mrf.mxu0  ;;  %v3523_v59 = vld [vmem:[#allocation31_spill] sm:$0xff] }
 0x2a1   : > { %v2184_v20 = vpop.eup %2183  ;;  %1425 = vst [vmem:[%s2646_s20 + $0x170] sm:$0xff] %v1361_v61  ;;  %v1364_v52 = vadd.f32 %v1332_v30, %v3241_v54  ;;  %2189 = vtanh.f32 %v3289_v33  ;;  %v3295_v36 = vadd.f32 %v1144_v28, %v3059_v46  ;;  %v3512_v54 = vsub.f32 %v3510_v1, %v3511_v11 }
 0x2a2   : > { %v1237_v24 = vadd.f32 0.5, %v1205_v22  ;;  %v1208_v12 = vmul.f32 0.5, %v2184_v20  ;;  %v3524_v9 = vsub.f32 %v3522_v10, %v3523_v59 }
 0x2a3   : > { %1428 = vst [vmem:[%s2646_s20 + $0x198] sm:$0xff] %v1364_v52  ;;  %2191 = vtanh.f32 %v3295_v36  ;;  %v3529_v52 = vld [vmem:[#allocation32_spill] sm:$0xff] }
 0x2a4   : > { %v2186_v14 = vpop.eup %2185  ;;  %v1295_v39 = vmul.f32 1.442695, %v1237_v24  ;;  %v1240_v53 = vadd.f32 0.5, %v1208_v12  ;;  %v1474_v19 = vadd.f32 %v1238_v47, %v1237_v24 }
 0x2a5   : > { %v1331_v27 = vmul.f32 %v2186_v14, %v3512_v54 }
 0x2a6   : > { %v2188_v17 = vpop.eup %2187  ;;  %2193 = vpow2.f32 %v1295_v39  ;;  %v1301_v46 = vmul.f32 1.442695, %v1240_v53  ;;  %v1095_v41 = vpop.f32.mrf.mxu3  ;;  %1475 = vadd.xlane.f32.xlu1 %v1474_v19 }
 0x2a7   : > { %v2190_v44 = vpop.eup %2189  ;;  %v1363_v34 = vadd.f32 %v1331_v27, %v3253_v4  ;;  %v1334_v48 = vmul.f32 %v2188_v17, %v3515_v57  ;;  %v1096_v60 = vadd.f32 %v1095_v41, %v3062_v29  ;;  %v3518_v29 = vsub.f32 %v3516_v45, %v3517_v51 }
 0x2a8   : > { %2195 = vpow2.f32 %v1301_v46  ;;  %v1207_v62 = vmul.f32 0.5, %v2190_v44 }
 0x2a9   : > { %v2192_v49 = vpop.eup %2191  ;;  %1427 = vst [vmem:[%s2646_s20 + $0x190] sm:$0xff] %v1363_v34  ;;  %v1366_v26 = vadd.f32 %v1334_v48, %v3259_v7  ;;  %2197 = vtanh.f32 %v1096_v60 }
 0x2aa   : > { %v1239_v21 = vadd.f32 0.5, %v1207_v62  ;;  %v1210_v13 = vmul.f32 0.5, %v2192_v49 }
 0x2ab   : > { %1430 = vst [vmem:[%s2646_s20 + $0x1b8] sm:$0xff] %v1366_v26 }
 0x2ac   : > { %v2194_v15 = vpop.eup %2193  ;;  %v1299_v23 = vmul.f32 1.442695, %v1239_v21  ;;  %v1242_v4 = vadd.f32 0.5, %v1210_v13  ;;  %v1477_v58 = vadd.f32 %v1240_v53, %v1239_v21 }
 0x2ad   : > { %v1333_v50 = vmul.f32 %v2194_v15, %v3518_v29 }
 0x2ae   : > { %v2196_v38 = vpop.eup %2195  ;;  %2199 = vpow2.f32 %v1299_v23  ;;  %v1305_v42 = vmul.f32 1.442695, %v1242_v4  ;;  %1478 = vadd.xlane.f32.xlu2 %v1477_v58 }
 0x2af   : > { %v2198_v7 = vpop.eup %2197  ;;  %v1365_v37 = vadd.f32 %v1333_v50, %v3271_v63  ;;  %v1336_v40 = vmul.f32 %v2196_v38, %v3521_v8 }
 0x2b0   : > { %2201 = vpow2.f32 %v1305_v42  ;;  %v1209_v47 = vmul.f32 0.5, %v2198_v7 }
 0x2b1   : > { %1429 = vst [vmem:[%s2646_s20 + $0x1b0] sm:$0xff] %v1365_v37  ;;  %v1368_v35 = vadd.f32 %v1336_v40, %v3277_v32  ;;  %v1437_v2 = vpop.xlane.xlu0 %1436 }
 0x2b2   : > { %v1241_v63 = vadd.f32 0.5, %v1209_v47  ;;  %1484 = vst.msk [vmem:[%s3321_s2] sm:$0xff] %vm1483_vm0, %v1437_v2 }
 0x2b3   : > { %1432 = vst [vmem:[%s2646_s20 + $0x1d8] sm:$0xff] %v1368_v35 }
 0x2b4   : > { %v2200_v18 = vpop.eup %2199  ;;  %v1303_v0 = vmul.f32 1.442695, %v1241_v63  ;;  %v1480_v6 = vadd.f32 %v1242_v4, %v1241_v63 }
 0x2b5   : > { %v1335_v56 = vmul.f32 %v2200_v18, %v3524_v9 }
 0x2b6   : > { %v2202_v61 = vpop.eup %2201  ;;  %2203 = vpow2.f32 %v1303_v0  ;;  %1481 = vadd.xlane.f32.xlu0 %v1480_v6 }
 0x2b7   : > { %v1367_v32 = vadd.f32 %v1335_v56, %v3289_v33  ;;  %v1338_v30 = vmul.f32 %v2202_v61, %v3527_v31  ;;  %v3528_v33 = vld [vmem:[#allocation29_spill] sm:$0xff] }
 0x2b8   : > { %v3530_v24 = vsub.f32 %v3528_v33, %v3529_v52 }
 0x2b9   : > { %1431 = vst [vmem:[%s2646_s20 + $0x1d0] sm:$0xff] %v1367_v32  ;;  %v1370_v22 = vadd.f32 %v1338_v30, %v3295_v36  ;;  %v1440_v28 = vpop.xlane.xlu0 %1439 }
 0x2ba   : > { %1485 = vst.msk [vmem:[%s3321_s2 + $0x8] sm:$0xff] %vm1483_vm0, %v1440_v28 }
 0x2bb   : > { %1434 = vst [vmem:[%s2646_s20 + $0x1f8] sm:$0xff] %v1370_v22 }
 0x2bc   : > { %v2204_v20 = vpop.eup %2203 }
 0x2bd   : > { %v1337_v12 = vmul.f32 %v2204_v20, %v3530_v24 }
 0x2bf   : > { %v1369_v14 = vadd.f32 %v1337_v12, %v1096_v60 }
 0x2c1   : > { %1433 = vst [vmem:[%s2646_s20 + $0x1f0] sm:$0xff] %v1369_v14  ;;  %v1443_v36 = vpop.xlane.xlu1 %1442 }
 0x2c2   : > { %1486 = vst.msk [vmem:[%s3321_s2 + $0x10] sm:$0xff] %vm1483_vm0, %v1443_v36 }
 0x2c3   : > { %2382 = shalt.err (!%p2379_p12)
}
 0x2c4   : > { %s2441_s21 = smov 512   ;;  %s2442_s20 = smov 32  }
 0x2c5   : > { %1934 = dma.vmem_to_hbm [thread:$0]  (%p2580_p5), %s1520_s13, 8192, %s1522_s25, %s1501_s22, %s2441_s21, %s2441_s21, %s2442_s20  }
 0x2c9   : > { %v1446_v39 = vpop.xlane.xlu1 %1445 }
 0x2ca   : > { %1487 = vst.msk [vmem:[%s3321_s2 + $0x18] sm:$0xff] %vm1483_vm0, %v1446_v39 }
 0x2d1   : > { %v1449_v53 = vpop.xlane.xlu2 %1448 }
 0x2d2   : > { %1488 = vst.msk [vmem:[%s3321_s2 + $0x20] sm:$0xff] %vm1483_vm0, %v1449_v53 }
 0x2d9   : > { %v1452_v19 = vpop.xlane.xlu2 %1451 }
 0x2da   : > { %1489 = vst.msk [vmem:[%s3321_s2 + $0x28] sm:$0xff] %vm1483_vm0, %v1452_v19 }
 0x2e1   : > { %v1455_v1 = vpop.xlane.xlu0 %1454 }
 0x2e2   : > { %1490 = vst.msk [vmem:[%s3321_s2 + $0x30] sm:$0xff] %vm1483_vm0, %v1455_v1 }
 0x2e9   : > { %v1458_v11 = vpop.xlane.xlu1 %1457 }
 0x2ea   : > { %1491 = vst.msk [vmem:[%s3321_s2 + $0x38] sm:$0xff] %vm1483_vm0, %v1458_v11 }
 0x2f1   : > { %v1461_v54 = vpop.xlane.xlu2 %1460 }
 0x2f2   : > { %1492 = vst.msk [vmem:[%s3321_s2 + $0x40] sm:$0xff] %vm1483_vm0, %v1461_v54 }
 0x2f9   : > { %v1464_v27 = vpop.xlane.xlu0 %1463 }
 0x2fa   : > { %1493 = vst.msk [vmem:[%s3321_s2 + $0x48] sm:$0xff] %vm1483_vm0, %v1464_v27 }
 0x301   : > { %v1467_v17 = vpop.xlane.xlu1 %1466 }
 0x302   : > { %1494 = vst.msk [vmem:[%s3321_s2 + $0x50] sm:$0xff] %vm1483_vm0, %v1467_v17 }
 0x309   : > { %v1470_v46 = vpop.xlane.xlu2 %1469 }
 0x30a   : > { %1495 = vst.msk [vmem:[%s3321_s2 + $0x58] sm:$0xff] %vm1483_vm0, %v1470_v46 }
 0x311   : > { %v1473_v41 = vpop.xlane.xlu0 %1472 }
 0x312   : > { %1496 = vst.msk [vmem:[%s3321_s2 + $0x60] sm:$0xff] %vm1483_vm0, %v1473_v41 }
 0x319   : > { %v1476_v44 = vpop.xlane.xlu1 %1475 }
 0x31a   : > { %1497 = vst.msk [vmem:[%s3321_s2 + $0x68] sm:$0xff] %vm1483_vm0, %v1476_v44 }
 0x321   : > { %v1479_v34 = vpop.xlane.xlu2 %1478 }
 0x322   : > { %1498 = vst.msk [vmem:[%s3321_s2 + $0x70] sm:$0xff] %vm1483_vm0, %v1479_v34 }
 0x329   : > { %v1482_v25 = vpop.xlane.xlu0 %1481 }
 0x32a   : > { %1499 = vst.msk [vmem:[%s3321_s2 + $0x78] sm:$0xff] %vm1483_vm0, %v1482_v25 }
 0x32b PF: > { %s1540_s17 = sand.u32 1, %s2417_s30   ;;  %p3531_p5 = scmp.ge.s32.totalorder %s2429_s12, 2 }
 0x32c   : > { %s1541_s15 = scalar_lea.sflag [#allocation4], %s1540_s17 }
 0x32d   : > { %p1954_p13 = pnand %p3531_p5, %p2528_p6 }
 0x32f   : > { %p1955_p0 = pneg %p1954_p13 }
 0x331   : > { %2412 = dma.done.wait (%p1955_p0), %s1541_s15, 8192  }
 0x332   : > { %2414 = vsyncadd (%p1955_p0), %s1541_s15, 4294959104  ;;  %p25_p3 = scmp.ge.s32.totalorder %s2567_s24, 4   ;;  %s3532_s30 = smov %s2421_s10 }
 0x333   : > { %s3533_s10 = smov %s2425_s11  ;;  %s3534_s11 = smov %s2576_s1 }
 0x334   : > { %s3535_s12 = smov %s2567_s24  ;;  %27 = sbr.rel (!%p25_p3) target bundleno = 11 (0xb), region = 125 }
 0x339   :  { %1555 = vsyncpa [#allocation3], 1 }
 0x33a   :  { %1557 = vsyncpa [#allocation3 + $0x1], 1 }
 0x33b   :  { %1558 = vsyncpa [#allocation6], 1 }
 0x33c   :  { %1559 = vsyncpa [#allocation9], 1 }
 0x33d   :  { %1560 = vsyncpa [#allocation4], 1 }
 0x33e   :  { %1562 = vsyncpa [#allocation4 + $0x1], 1 }

</bundles_post_ra>
